<compile_context>
chip_gen: v7x
topology: tpu7x:2x2x1
jax: 0.10.0
libtpu: 0.0.40
codegen_flags: <defaults>
</compile_context>

<pallas_src>
import math

import jax
import jax.numpy as jnp
from jax import lax
from jax.experimental import pallas as pl
from jax.experimental.pallas import tpu as pltpu

# ---- model hyperparameters (small, consistent with the module) ----
D_MODEL = 32      # d_model
NHEAD = 4         # nhead
HEAD_DIM = D_MODEL // NHEAD
DIM_FF = 64       # dim_feedforward
SEQ = 16          # sequence length
BATCH = 2         # batch size
LN_EPS = 1e-5
_NEG_INF = -1e30


def _layer_norm(x, gamma, beta):
    mean = jnp.mean(x, axis=-1, keepdims=True)
    var = jnp.mean((x - mean) ** 2, axis=-1, keepdims=True)
    return (x - mean) * lax.rsqrt(var + LN_EPS) * gamma + beta


def _encoder_layer_kernel(src_ref, pos_ref,
                          wqk_ref, bqk_ref, wv_ref, bv_ref,
                          wo_ref, bo_ref,
                          w1_ref, b1_ref, w2_ref, b2_ref,
                          g1_ref, beta1_ref, g2_ref, beta2_ref,
                          out_ref):
    """Single invocation: processes the full (S, B, D) problem at once."""
    S, B, D = src_ref.shape
    N = S * B

    # Flatten (S, B, D) -> (S*B, D); flattened row n belongs to batch (n % B).
    src = src_ref[...].astype(jnp.float32).reshape(N, D)
    pos = pos_ref[...].astype(jnp.float32).reshape(N, D)
    qk_in = src + pos                                   # with_pos_embed(src, pos)

    # Fused q/k input projection (weights pre-transposed in the wrapper).
    qk = jnp.dot(qk_in, wqk_ref[...], preferred_element_type=jnp.float32) + bqk_ref[...]
    q = qk[:, :D] * (1.0 / math.sqrt(HEAD_DIM))
    k = qk[:, D:]
    v = jnp.dot(src, wv_ref[...], preferred_element_type=jnp.float32) + bv_ref[...]

    # Additive batch-block mask: token i may only attend to token j of the same batch.
    row_b = lax.broadcasted_iota(jnp.int32, (N, N), 0) % B
    col_b = lax.broadcasted_iota(jnp.int32, (N, N), 1) % B
    mask_bias = jnp.where(row_b == col_b, 0.0, _NEG_INF).astype(jnp.float32)

    wo = wo_ref[...]                                    # (D, D), already transposed
    # Accumulate the output projection head-by-head (no lane-concatenate needed):
    #   concat_h(ctx_h) @ Wo^T == sum_h ctx_h @ Wo^T[h*hd:(h+1)*hd, :]
    src2 = bo_ref[...]                                  # (1, D), broadcasts on first add
    for h in range(NHEAD):
        lo = h * HEAD_DIM
        qh = q[:, lo:lo + HEAD_DIM]                     # (N, hd)
        kh = k[:, lo:lo + HEAD_DIM]
        vh = v[:, lo:lo + HEAD_DIM]
        # scores = qh @ kh^T without materializing a transpose
        s = lax.dot_general(qh, kh, (((1,), (1,)), ((), ())),
                            preferred_element_type=jnp.float32)      # (N, N)
        s = s + mask_bias
        s = s - jnp.max(s, axis=-1, keepdims=True)
        e = jnp.exp(s)
        p = e * pl.reciprocal(jnp.sum(e, axis=-1, keepdims=True), approx=True)
        ctx = jnp.dot(p, vh, preferred_element_type=jnp.float32)     # (N, hd)
        src2 = src2 + jnp.dot(ctx, wo[lo:lo + HEAD_DIM, :],
                              preferred_element_type=jnp.float32)    # (N, D)

    # residual + LayerNorm1   (dropout1 == identity, eval mode)
    x = _layer_norm(src + src2, g1_ref[...], beta1_ref[...])

    # feed-forward: linear2(dropout(relu(linear1(x))))   (dropout == identity)
    h1 = jnp.dot(x, w1_ref[...], preferred_element_type=jnp.float32) + b1_ref[...]
    h1 = jnp.maximum(h1, 0.0)
    ff = jnp.dot(h1, w2_ref[...], preferred_element_type=jnp.float32) + b2_ref[...]

    # residual + LayerNorm2   (dropout2 == identity)
    y = _layer_norm(x + ff, g2_ref[...], beta2_ref[...])

    out_ref[...] = y.reshape(S, B, D).astype(out_ref.dtype)


def prepare_kernel_params(p):
    """One-time weight prep: transpose / split so the kernel never transposes or slices
    the (3D, D) in_proj weight. Biases and LN params become (1, X) rows."""
    D, F = D_MODEL, DIM_FF
    wqkv, bqkv = p["in_proj_w"], p["in_proj_b"]
    return (
        jnp.transpose(wqkv[:2 * D, :]),          # wqk_t  (D, 2D)  fused q/k projection
        bqkv[:2 * D].reshape(1, 2 * D),          # bqk    (1, 2D)
        jnp.transpose(wqkv[2 * D:, :]),          # wv_t   (D, D)
        bqkv[2 * D:].reshape(1, D),              # bv     (1, D)
        jnp.transpose(p["out_proj_w"]),          # wo_t   (D, D)
        p["out_proj_b"].reshape(1, D),           # bo     (1, D)
        jnp.transpose(p["lin1_w"]),              # w1_t   (D, F)
        p["lin1_b"].reshape(1, F),               # b1     (1, F)
        jnp.transpose(p["lin2_w"]),              # w2_t   (F, D)
        p["lin2_b"].reshape(1, D),               # b2     (1, D)
        p["norm1_w"].reshape(1, D),              # g1
        p["norm1_b"].reshape(1, D),              # beta1
        p["norm2_w"].reshape(1, D),              # g2
        p["norm2_b"].reshape(1, D),              # beta2
    )


def transformer_encoder_layer(src_sbd, pos_sbd, kernel_params):
    """src_sbd, pos_sbd: (S, B, D) float32 — native PyTorch (seq, batch, d_model) layout.
    kernel_params: tuple from prepare_kernel_params (built once)."""
    S, B, D = src_sbd.shape
    n_in = 2 + len(kernel_params)
    vmem_spec = lambda: pl.BlockSpec(memory_space=pltpu.MemorySpace.VMEM)
    return pl.pallas_call(
        _encoder_layer_kernel,
        out_shape=jax.ShapeDtypeStruct((S, B, D), jnp.float32),
        in_specs=[vmem_spec() for _ in range(n_in)],
        out_specs=vmem_spec(),
    )(src_sbd, pos_sbd, *kernel_params)


# ------------------------- pure-JAX reference (for sanity) -------------------------
def _reference(src_sbd, pos_sbd, p):
    src = jnp.transpose(src_sbd, (1, 0, 2)).astype(jnp.float32)   # (B, S, D)
    pos = jnp.transpose(pos_sbd, (1, 0, 2)).astype(jnp.float32)
    qk_in = src + pos
    wq, wk, wv = jnp.split(p["in_proj_w"], 3, axis=0)
    bq, bk, bv = jnp.split(p["in_proj_b"], 3)
    q = qk_in @ wq.T + bq
    k = qk_in @ wk.T + bk
    v = src @ wv.T + bv
    B, S, D = q.shape
    qh = q.reshape(B, S, NHEAD, HEAD_DIM).transpose(0, 2, 1, 3) / math.sqrt(HEAD_DIM)
    kh = k.reshape(B, S, NHEAD, HEAD_DIM).transpose(0, 2, 1, 3)
    vh = v.reshape(B, S, NHEAD, HEAD_DIM).transpose(0, 2, 1, 3)
    s = jnp.einsum("bhqd,bhkd->bhqk", qh, kh)
    pattn = jax.nn.softmax(s, axis=-1)
    o = jnp.einsum("bhqk,bhkd->bhqd", pattn, vh).transpose(0, 2, 1, 3).reshape(B, S, D)
    src2 = o @ p["out_proj_w"].T + p["out_proj_b"]
    x = src + src2
    mean = x.mean(-1, keepdims=True)
    var = ((x - mean) ** 2).mean(-1, keepdims=True)
    x = (x - mean) / jnp.sqrt(var + LN_EPS) * p["norm1_w"] + p["norm1_b"]
    h1 = jax.nn.relu(x @ p["lin1_w"].T + p["lin1_b"])
    ff = h1 @ p["lin2_w"].T + p["lin2_b"]
    y = x + ff
    mean = y.mean(-1, keepdims=True)
    var = ((y - mean) ** 2).mean(-1, keepdims=True)
    y = (y - mean) / jnp.sqrt(var + LN_EPS) * p["norm2_w"] + p["norm2_b"]
    return jnp.transpose(y, (1, 0, 2))


if __name__ == "__main__":
    key = jax.random.PRNGKey(0)
    ks = jax.random.split(key, 16)

    # PyTorch-layout parameters (as nn.MultiheadAttention / nn.Linear / nn.LayerNorm store them)
    params = {
        "in_proj_w":  0.1 * jax.random.normal(ks[0], (3 * D_MODEL, D_MODEL), jnp.float32),
        "in_proj_b":  0.05 * jax.random.normal(ks[1], (3 * D_MODEL,), jnp.float32),
        "out_proj_w": 0.1 * jax.random.normal(ks[2], (D_MODEL, D_MODEL), jnp.float32),
        "out_proj_b": 0.05 * jax.random.normal(ks[3], (D_MODEL,), jnp.float32),
        "lin1_w":     0.1 * jax.random.normal(ks[4], (DIM_FF, D_MODEL), jnp.float32),
        "lin1_b":     0.05 * jax.random.normal(ks[5], (DIM_FF,), jnp.float32),
        "lin2_w":     0.1 * jax.random.normal(ks[6], (D_MODEL, DIM_FF), jnp.float32),
        "lin2_b":     0.05 * jax.random.normal(ks[7], (D_MODEL,), jnp.float32),
        "norm1_w":    1.0 + 0.1 * jax.random.normal(ks[10], (D_MODEL,), jnp.float32),
        "norm1_b":    0.05 * jax.random.normal(ks[11], (D_MODEL,), jnp.float32),
        "norm2_w":    1.0 + 0.1 * jax.random.normal(ks[12], (D_MODEL,), jnp.float32),
        "norm2_b":    0.05 * jax.random.normal(ks[13], (D_MODEL,), jnp.float32),
    }

    src = jax.random.normal(ks[8], (SEQ, BATCH, D_MODEL), jnp.float32)   # (S, B, D)
    pos = jax.random.normal(ks[9], (SEQ, BATCH, D_MODEL), jnp.float32)   # (S, B, D)

    # Weight prep done ONCE (pre-transposed / pre-split / fused q+k).
    kernel_params = jax.block_until_ready(prepare_kernel_params(params))

    out = transformer_encoder_layer(src, pos, kernel_params)
    out = jax.block_until_ready(out)

    ref = _reference(src, pos, params)
    assert out.shape == (SEQ, BATCH, D_MODEL)
    # Tolerance slightly relaxed (2e-3) because of the approximate EUP reciprocal
    # used for the softmax denominator.
    assert jnp.allclose(out, ref, atol=2e-3, rtol=2e-3), "mismatch vs reference"

    print("KERNEL_OK")
</pallas_src>

<mosaic_0001>
module attributes {stable_mosaic.version = 11 : i64} {
  func.func @_encoder_layer_kernel(%arg0: memref<16x2x32xf32, #tpu.memory_space<vmem>>, %arg1: memref<16x2x32xf32, #tpu.memory_space<vmem>>, %arg2: memref<32x64xf32, #tpu.memory_space<vmem>>, %arg3: memref<1x64xf32, #tpu.memory_space<vmem>>, %arg4: memref<32x32xf32, #tpu.memory_space<vmem>>, %arg5: memref<1x32xf32, #tpu.memory_space<vmem>>, %arg6: memref<32x32xf32, #tpu.memory_space<vmem>>, %arg7: memref<1x32xf32, #tpu.memory_space<vmem>>, %arg8: memref<32x64xf32, #tpu.memory_space<vmem>>, %arg9: memref<1x64xf32, #tpu.memory_space<vmem>>, %arg10: memref<64x32xf32, #tpu.memory_space<vmem>>, %arg11: memref<1x32xf32, #tpu.memory_space<vmem>>, %arg12: memref<1x32xf32, #tpu.memory_space<vmem>>, %arg13: memref<1x32xf32, #tpu.memory_space<vmem>>, %arg14: memref<1x32xf32, #tpu.memory_space<vmem>>, %arg15: memref<1x32xf32, #tpu.memory_space<vmem>>, %arg16: memref<16x2x32xf32, #tpu.memory_space<vmem>>) attributes {dimension_semantics = [], scalar_prefetch = 0 : i64, scratch_operands = 0 : i64, tpu.core_type = #tpu.core_type<tc>} {
    %c0 = arith.constant 0 : index
    %c0_0 = arith.constant 0 : index
    %c0_1 = arith.constant 0 : index
    %0 = vector.load %arg0[%c0, %c0_0, %c0_1] : memref<16x2x32xf32, #tpu.memory_space<vmem>>, vector<16x2x32xf32>
    %1 = vector.shape_cast %0 : vector<16x2x32xf32> to vector<32x32xf32>
    %c0_2 = arith.constant 0 : index
    %c0_3 = arith.constant 0 : index
    %c0_4 = arith.constant 0 : index
    %2 = vector.load %arg1[%c0_2, %c0_3, %c0_4] : memref<16x2x32xf32, #tpu.memory_space<vmem>>, vector<16x2x32xf32>
    %3 = vector.shape_cast %2 : vector<16x2x32xf32> to vector<32x32xf32>
    %4 = arith.addf %1, %3 : vector<32x32xf32>
    %c0_5 = arith.constant 0 : index
    %c0_6 = arith.constant 0 : index
    %5 = vector.load %arg2[%c0_5, %c0_6] : memref<32x64xf32, #tpu.memory_space<vmem>>, vector<32x64xf32>
    %cst = arith.constant dense<0.000000e+00> : vector<32x64xf32>
    %6 = tpu.matmul %4, %5, %cst {dimension_numbers = #tpu.dot_dimension_numbers<[1], [0], [0], [1], [0, 0, 1, 1], [], []>} : vector<32x32xf32>, vector<32x64xf32>, vector<32x64xf32> -> vector<32x64xf32>
    %c0_7 = arith.constant 0 : index
    %c0_8 = arith.constant 0 : index
    %7 = vector.load %arg3[%c0_7, %c0_8] : memref<1x64xf32, #tpu.memory_space<vmem>>, vector<1x64xf32>
    %8 = vector.broadcast %7 : vector<1x64xf32> to vector<32x64xf32>
    %9 = arith.addf %6, %8 : vector<32x64xf32>
    %10 = vector.extract_strided_slice %9 {offsets = [0, 0], sizes = [32, 32], strides = [1, 1]} : vector<32x64xf32> to vector<32x32xf32>
    %cst_9 = arith.constant 0.353553385 : f32
    %11 = vector.broadcast %cst_9 : f32 to vector<32x32xf32>
    %12 = arith.mulf %10, %11 : vector<32x32xf32>
    %13 = vector.extract_strided_slice %9 {offsets = [0, 32], sizes = [32, 32], strides = [1, 1]} : vector<32x64xf32> to vector<32x32xf32>
    %c0_10 = arith.constant 0 : index
    %c0_11 = arith.constant 0 : index
    %14 = vector.load %arg4[%c0_10, %c0_11] : memref<32x32xf32, #tpu.memory_space<vmem>>, vector<32x32xf32>
    %cst_12 = arith.constant dense<0.000000e+00> : vector<32x32xf32>
    %15 = tpu.matmul %1, %14, %cst_12 {dimension_numbers = #tpu.dot_dimension_numbers<[1], [0], [0], [1], [0, 0, 1, 1], [], []>} : vector<32x32xf32>, vector<32x32xf32>, vector<32x32xf32> -> vector<32x32xf32>
    %c0_13 = arith.constant 0 : index
    %c0_14 = arith.constant 0 : index
    %16 = vector.load %arg5[%c0_13, %c0_14] : memref<1x32xf32, #tpu.memory_space<vmem>>, vector<1x32xf32>
    %17 = vector.broadcast %16 : vector<1x32xf32> to vector<32x32xf32>
    %18 = arith.addf %15, %17 : vector<32x32xf32>
    %19 = tpu.iota {dimensions = array<i32: 0>} : vector<32x32xi32>
    %c2_i32 = arith.constant 2 : i32
    %c0_i32 = arith.constant 0 : i32
    %20 = arith.cmpi eq, %c2_i32, %c0_i32 : i32
    %c1_i32 = arith.constant 1 : i32
    %21 = arith.select %20, %c1_i32, %c2_i32 : i32
    %22 = vector.broadcast %21 : i32 to vector<32x32xi32>
    %23 = arith.remsi %19, %22 : vector<32x32xi32>
    %c0_i32_15 = arith.constant 0 : i32
    %24 = vector.broadcast %c0_i32_15 : i32 to vector<32x32xi32>
    %25 = arith.cmpi ne, %23, %24 : vector<32x32xi32>
    %c0_i32_16 = arith.constant 0 : i32
    %26 = vector.broadcast %c0_i32_16 : i32 to vector<32x32xi32>
    %27 = arith.cmpi slt, %23, %26 : vector<32x32xi32>
    %c0_i32_17 = arith.constant 0 : i32
    %28 = arith.cmpi slt, %21, %c0_i32_17 : i32
    %29 = vector.broadcast %28 : i1 to vector<32x32xi1>
    %30 = vector.broadcast %29 : vector<32x32xi1> to vector<32x32xi1>
    %31 = arith.xori %27, %30 : vector<32x32xi1>
    %32 = arith.andi %31, %25 : vector<32x32xi1>
    %33 = vector.broadcast %21 : i32 to vector<32x32xi32>
    %34 = arith.addi %23, %33 : vector<32x32xi32>
    %35 = arith.select %32, %34, %23 : vector<32x32xi1>, vector<32x32xi32>
    %36 = tpu.iota {dimensions = array<i32: 1>} : vector<32x32xi32>
    %c2_i32_18 = arith.constant 2 : i32
    %c0_i32_19 = arith.constant 0 : i32
    %37 = arith.cmpi eq, %c2_i32_18, %c0_i32_19 : i32
    %c1_i32_20 = arith.constant 1 : i32
    %38 = arith.select %37, %c1_i32_20, %c2_i32_18 : i32
    %39 = vector.broadcast %38 : i32 to vector<32x32xi32>
    %40 = arith.remsi %36, %39 : vector<32x32xi32>
    %c0_i32_21 = arith.constant 0 : i32
    %41 = vector.broadcast %c0_i32_21 : i32 to vector<32x32xi32>
    %42 = arith.cmpi ne, %40, %41 : vector<32x32xi32>
    %c0_i32_22 = arith.constant 0 : i32
    %43 = vector.broadcast %c0_i32_22 : i32 to vector<32x32xi32>
    %44 = arith.cmpi slt, %40, %43 : vector<32x32xi32>
    %c0_i32_23 = arith.constant 0 : i32
    %45 = arith.cmpi slt, %38, %c0_i32_23 : i32
    %46 = vector.broadcast %45 : i1 to vector<32x32xi1>
    %47 = vector.broadcast %46 : vector<32x32xi1> to vector<32x32xi1>
    %48 = arith.xori %44, %47 : vector<32x32xi1>
    %49 = arith.andi %48, %42 : vector<32x32xi1>
    %50 = vector.broadcast %38 : i32 to vector<32x32xi32>
    %51 = arith.addi %40, %50 : vector<32x32xi32>
    %52 = arith.select %49, %51, %40 : vector<32x32xi1>, vector<32x32xi32>
    %53 = arith.cmpi eq, %35, %52 : vector<32x32xi32>
    %cst_24 = arith.constant 0.000000e+00 : f32
    %cst_25 = arith.constant -1.000000e+30 : f32
    %54 = vector.broadcast %cst_24 : f32 to vector<32x32xf32>
    %55 = vector.broadcast %cst_25 : f32 to vector<32x32xf32>
    %56 = arith.select %53, %54, %55 : vector<32x32xi1>, vector<32x32xf32>
    %c0_26 = arith.constant 0 : index
    %c0_27 = arith.constant 0 : index
    %57 = vector.load %arg6[%c0_26, %c0_27] : memref<32x32xf32, #tpu.memory_space<vmem>>, vector<32x32xf32>
    %c0_28 = arith.constant 0 : index
    %c0_29 = arith.constant 0 : index
    %58 = vector.load %arg7[%c0_28, %c0_29] : memref<1x32xf32, #tpu.memory_space<vmem>>, vector<1x32xf32>
    %59 = vector.extract_strided_slice %12 {offsets = [0, 0], sizes = [32, 8], strides = [1, 1]} : vector<32x32xf32> to vector<32x8xf32>
    %60 = vector.extract_strided_slice %13 {offsets = [0, 0], sizes = [32, 8], strides = [1, 1]} : vector<32x32xf32> to vector<32x8xf32>
    %61 = vector.extract_strided_slice %18 {offsets = [0, 0], sizes = [32, 8], strides = [1, 1]} : vector<32x32xf32> to vector<32x8xf32>
    %cst_30 = arith.constant dense<0.000000e+00> : vector<32x32xf32>
    %62 = tpu.matmul %59, %60, %cst_30 {dimension_numbers = #tpu.dot_dimension_numbers<[1], [1], [0], [0], [0, 0, 1, 0], [], []>} : vector<32x8xf32>, vector<32x8xf32>, vector<32x32xf32> -> vector<32x32xf32>
    %63 = arith.addf %62, %56 : vector<32x32xf32>
    %cst_31 = arith.constant dense<0xFF800000> : vector<32xf32>
    %64 = vector.multi_reduction <maximumf>, %63, %cst_31 [1] : vector<32x32xf32> to vector<32xf32>
    %65 = vector.shape_cast %64 : vector<32xf32> to vector<32x1xf32>
    %66 = vector.broadcast %65 : vector<32x1xf32> to vector<32x32xf32>
    %67 = arith.subf %63, %66 : vector<32x32xf32>
    %68 = math.exp %67 : vector<32x32xf32>
    %cst_32 = arith.constant dense<0.000000e+00> : vector<32xf32>
    %69 = vector.multi_reduction <add>, %68, %cst_32 [1] : vector<32x32xf32> to vector<32xf32>
    %70 = vector.shape_cast %69 : vector<32xf32> to vector<32x1xf32>
    %71 = tpu.reciprocal %70 {approx = true} : vector<32x1xf32> -> vector<32x1xf32>
    %72 = vector.broadcast %71 : vector<32x1xf32> to vector<32x32xf32>
    %73 = arith.mulf %68, %72 : vector<32x32xf32>
    %cst_33 = arith.constant dense<0.000000e+00> : vector<32x8xf32>
    %74 = tpu.matmul %73, %61, %cst_33 {dimension_numbers = #tpu.dot_dimension_numbers<[1], [0], [0], [1], [0, 0, 1, 1], [], []>} : vector<32x32xf32>, vector<32x8xf32>, vector<32x8xf32> -> vector<32x8xf32>
    %75 = vector.extract_strided_slice %57 {offsets = [0, 0], sizes = [8, 32], strides = [1, 1]} : vector<32x32xf32> to vector<8x32xf32>
    %cst_34 = arith.constant dense<0.000000e+00> : vector<32x32xf32>
    %76 = tpu.matmul %74, %75, %cst_34 {dimension_numbers = #tpu.dot_dimension_numbers<[1], [0], [0], [1], [0, 0, 1, 1], [], []>} : vector<32x8xf32>, vector<8x32xf32>, vector<32x32xf32> -> vector<32x32xf32>
    %77 = vector.broadcast %58 : vector<1x32xf32> to vector<32x32xf32>
    %78 = arith.addf %77, %76 : vector<32x32xf32>
    %79 = vector.extract_strided_slice %12 {offsets = [0, 8], sizes = [32, 8], strides = [1, 1]} : vector<32x32xf32> to vector<32x8xf32>
    %80 = vector.extract_strided_slice %13 {offsets = [0, 8], sizes = [32, 8], strides = [1, 1]} : vector<32x32xf32> to vector<32x8xf32>
    %81 = vector.extract_strided_slice %18 {offsets = [0, 8], sizes = [32, 8], strides = [1, 1]} : vector<32x32xf32> to vector<32x8xf32>
    %cst_35 = arith.constant dense<0.000000e+00> : vector<32x32xf32>
    %82 = tpu.matmul %79, %80, %cst_35 {dimension_numbers = #tpu.dot_dimension_numbers<[1], [1], [0], [0], [0, 0, 1, 0], [], []>} : vector<32x8xf32>, vector<32x8xf32>, vector<32x32xf32> -> vector<32x32xf32>
    %83 = arith.addf %82, %56 : vector<32x32xf32>
    %cst_36 = arith.constant dense<0xFF800000> : vector<32xf32>
    %84 = vector.multi_reduction <maximumf>, %83, %cst_36 [1] : vector<32x32xf32> to vector<32xf32>
    %85 = vector.shape_cast %84 : vector<32xf32> to vector<32x1xf32>
    %86 = vector.broadcast %85 : vector<32x1xf32> to vector<32x32xf32>
    %87 = arith.subf %83, %86 : vector<32x32xf32>
    %88 = math.exp %87 : vector<32x32xf32>
    %cst_37 = arith.constant dense<0.000000e+00> : vector<32xf32>
    %89 = vector.multi_reduction <add>, %88, %cst_37 [1] : vector<32x32xf32> to vector<32xf32>
    %90 = vector.shape_cast %89 : vector<32xf32> to vector<32x1xf32>
    %91 = tpu.reciprocal %90 {approx = true} : vector<32x1xf32> -> vector<32x1xf32>
    %92 = vector.broadcast %91 : vector<32x1xf32> to vector<32x32xf32>
    %93 = arith.mulf %88, %92 : vector<32x32xf32>
    %cst_38 = arith.constant dense<0.000000e+00> : vector<32x8xf32>
    %94 = tpu.matmul %93, %81, %cst_38 {dimension_numbers = #tpu.dot_dimension_numbers<[1], [0], [0], [1], [0, 0, 1, 1], [], []>} : vector<32x32xf32>, vector<32x8xf32>, vector<32x8xf32> -> vector<32x8xf32>
    %95 = vector.extract_strided_slice %57 {offsets = [8, 0], sizes = [8, 32], strides = [1, 1]} : vector<32x32xf32> to vector<8x32xf32>
    %cst_39 = arith.constant dense<0.000000e+00> : vector<32x32xf32>
    %96 = tpu.matmul %94, %95, %cst_39 {dimension_numbers = #tpu.dot_dimension_numbers<[1], [0], [0], [1], [0, 0, 1, 1], [], []>} : vector<32x8xf32>, vector<8x32xf32>, vector<32x32xf32> -> vector<32x32xf32>
    %97 = arith.addf %78, %96 : vector<32x32xf32>
    %98 = vector.extract_strided_slice %12 {offsets = [0, 16], sizes = [32, 8], strides = [1, 1]} : vector<32x32xf32> to vector<32x8xf32>
    %99 = vector.extract_strided_slice %13 {offsets = [0, 16], sizes = [32, 8], strides = [1, 1]} : vector<32x32xf32> to vector<32x8xf32>
    %100 = vector.extract_strided_slice %18 {offsets = [0, 16], sizes = [32, 8], strides = [1, 1]} : vector<32x32xf32> to vector<32x8xf32>
    %cst_40 = arith.constant dense<0.000000e+00> : vector<32x32xf32>
    %101 = tpu.matmul %98, %99, %cst_40 {dimension_numbers = #tpu.dot_dimension_numbers<[1], [1], [0], [0], [0, 0, 1, 0], [], []>} : vector<32x8xf32>, vector<32x8xf32>, vector<32x32xf32> -> vector<32x32xf32>
    %102 = arith.addf %101, %56 : vector<32x32xf32>
    %cst_41 = arith.constant dense<0xFF800000> : vector<32xf32>
    %103 = vector.multi_reduction <maximumf>, %102, %cst_41 [1] : vector<32x32xf32> to vector<32xf32>
    %104 = vector.shape_cast %103 : vector<32xf32> to vector<32x1xf32>
    %105 = vector.broadcast %104 : vector<32x1xf32> to vector<32x32xf32>
    %106 = arith.subf %102, %105 : vector<32x32xf32>
    %107 = math.exp %106 : vector<32x32xf32>
    %cst_42 = arith.constant dense<0.000000e+00> : vector<32xf32>
    %108 = vector.multi_reduction <add>, %107, %cst_42 [1] : vector<32x32xf32> to vector<32xf32>
    %109 = vector.shape_cast %108 : vector<32xf32> to vector<32x1xf32>
    %110 = tpu.reciprocal %109 {approx = true} : vector<32x1xf32> -> vector<32x1xf32>
    %111 = vector.broadcast %110 : vector<32x1xf32> to vector<32x32xf32>
    %112 = arith.mulf %107, %111 : vector<32x32xf32>
    %cst_43 = arith.constant dense<0.000000e+00> : vector<32x8xf32>
    %113 = tpu.matmul %112, %100, %cst_43 {dimension_numbers = #tpu.dot_dimension_numbers<[1], [0], [0], [1], [0, 0, 1, 1], [], []>} : vector<32x32xf32>, vector<32x8xf32>, vector<32x8xf32> -> vector<32x8xf32>
    %114 = vector.extract_strided_slice %57 {offsets = [16, 0], sizes = [8, 32], strides = [1, 1]} : vector<32x32xf32> to vector<8x32xf32>
    %cst_44 = arith.constant dense<0.000000e+00> : vector<32x32xf32>
    %115 = tpu.matmul %113, %114, %cst_44 {dimension_numbers = #tpu.dot_dimension_numbers<[1], [0], [0], [1], [0, 0, 1, 1], [], []>} : vector<32x8xf32>, vector<8x32xf32>, vector<32x32xf32> -> vector<32x32xf32>
    %116 = arith.addf %97, %115 : vector<32x32xf32>
    %117 = vector.extract_strided_slice %12 {offsets = [0, 24], sizes = [32, 8], strides = [1, 1]} : vector<32x32xf32> to vector<32x8xf32>
    %118 = vector.extract_strided_slice %13 {offsets = [0, 24], sizes = [32, 8], strides = [1, 1]} : vector<32x32xf32> to vector<32x8xf32>
    %119 = vector.extract_strided_slice %18 {offsets = [0, 24], sizes = [32, 8], strides = [1, 1]} : vector<32x32xf32> to vector<32x8xf32>
    %cst_45 = arith.constant dense<0.000000e+00> : vector<32x32xf32>
    %120 = tpu.matmul %117, %118, %cst_45 {dimension_numbers = #tpu.dot_dimension_numbers<[1], [1], [0], [0], [0, 0, 1, 0], [], []>} : vector<32x8xf32>, vector<32x8xf32>, vector<32x32xf32> -> vector<32x32xf32>
    %121 = arith.addf %120, %56 : vector<32x32xf32>
    %cst_46 = arith.constant dense<0xFF800000> : vector<32xf32>
    %122 = vector.multi_reduction <maximumf>, %121, %cst_46 [1] : vector<32x32xf32> to vector<32xf32>
    %123 = vector.shape_cast %122 : vector<32xf32> to vector<32x1xf32>
    %124 = vector.broadcast %123 : vector<32x1xf32> to vector<32x32xf32>
    %125 = arith.subf %121, %124 : vector<32x32xf32>
    %126 = math.exp %125 : vector<32x32xf32>
    %cst_47 = arith.constant dense<0.000000e+00> : vector<32xf32>
    %127 = vector.multi_reduction <add>, %126, %cst_47 [1] : vector<32x32xf32> to vector<32xf32>
    %128 = vector.shape_cast %127 : vector<32xf32> to vector<32x1xf32>
    %129 = tpu.reciprocal %128 {approx = true} : vector<32x1xf32> -> vector<32x1xf32>
    %130 = vector.broadcast %129 : vector<32x1xf32> to vector<32x32xf32>
    %131 = arith.mulf %126, %130 : vector<32x32xf32>
    %cst_48 = arith.constant dense<0.000000e+00> : vector<32x8xf32>
    %132 = tpu.matmul %131, %119, %cst_48 {dimension_numbers = #tpu.dot_dimension_numbers<[1], [0], [0], [1], [0, 0, 1, 1], [], []>} : vector<32x32xf32>, vector<32x8xf32>, vector<32x8xf32> -> vector<32x8xf32>
    %133 = vector.extract_strided_slice %57 {offsets = [24, 0], sizes = [8, 32], strides = [1, 1]} : vector<32x32xf32> to vector<8x32xf32>
    %cst_49 = arith.constant dense<0.000000e+00> : vector<32x32xf32>
    %134 = tpu.matmul %132, %133, %cst_49 {dimension_numbers = #tpu.dot_dimension_numbers<[1], [0], [0], [1], [0, 0, 1, 1], [], []>} : vector<32x8xf32>, vector<8x32xf32>, vector<32x32xf32> -> vector<32x32xf32>
    %135 = arith.addf %116, %134 : vector<32x32xf32>
    %136 = arith.addf %1, %135 : vector<32x32xf32>
    %c0_50 = arith.constant 0 : index
    %c0_51 = arith.constant 0 : index
    %137 = vector.load %arg12[%c0_50, %c0_51] : memref<1x32xf32, #tpu.memory_space<vmem>>, vector<1x32xf32>
    %c0_52 = arith.constant 0 : index
    %c0_53 = arith.constant 0 : index
    %138 = vector.load %arg13[%c0_52, %c0_53] : memref<1x32xf32, #tpu.memory_space<vmem>>, vector<1x32xf32>
    %cst_54 = arith.constant dense<0.000000e+00> : vector<32xf32>
    %139 = vector.multi_reduction <add>, %136, %cst_54 [1] : vector<32x32xf32> to vector<32xf32>
    %140 = vector.shape_cast %139 : vector<32xf32> to vector<32x1xf32>
    %cst_55 = arith.constant 3.200000e+01 : f32
    %141 = vector.broadcast %cst_55 : f32 to vector<32x1xf32>
    %142 = arith.divf %140, %141 : vector<32x1xf32>
    %143 = vector.broadcast %142 : vector<32x1xf32> to vector<32x32xf32>
    %144 = arith.subf %136, %143 : vector<32x32xf32>
    %145 = arith.mulf %144, %144 : vector<32x32xf32>
    %cst_56 = arith.constant dense<0.000000e+00> : vector<32xf32>
    %146 = vector.multi_reduction <add>, %145, %cst_56 [1] : vector<32x32xf32> to vector<32xf32>
    %147 = vector.shape_cast %146 : vector<32xf32> to vector<32x1xf32>
    %cst_57 = arith.constant 3.200000e+01 : f32
    %148 = vector.broadcast %cst_57 : f32 to vector<32x1xf32>
    %149 = arith.divf %147, %148 : vector<32x1xf32>
    %150 = vector.broadcast %142 : vector<32x1xf32> to vector<32x32xf32>
    %151 = arith.subf %136, %150 : vector<32x32xf32>
    %cst_58 = arith.constant 9.99999974E-6 : f32
    %152 = vector.broadcast %cst_58 : f32 to vector<32x1xf32>
    %153 = arith.addf %149, %152 : vector<32x1xf32>
    %154 = math.rsqrt %153 : vector<32x1xf32>
    %155 = vector.broadcast %154 : vector<32x1xf32> to vector<32x32xf32>
    %156 = arith.mulf %151, %155 : vector<32x32xf32>
    %157 = vector.broadcast %137 : vector<1x32xf32> to vector<32x32xf32>
    %158 = arith.mulf %156, %157 : vector<32x32xf32>
    %159 = vector.broadcast %138 : vector<1x32xf32> to vector<32x32xf32>
    %160 = arith.addf %158, %159 : vector<32x32xf32>
    %c0_59 = arith.constant 0 : index
    %c0_60 = arith.constant 0 : index
    %161 = vector.load %arg8[%c0_59, %c0_60] : memref<32x64xf32, #tpu.memory_space<vmem>>, vector<32x64xf32>
    %cst_61 = arith.constant dense<0.000000e+00> : vector<32x64xf32>
    %162 = tpu.matmul %160, %161, %cst_61 {dimension_numbers = #tpu.dot_dimension_numbers<[1], [0], [0], [1], [0, 0, 1, 1], [], []>} : vector<32x32xf32>, vector<32x64xf32>, vector<32x64xf32> -> vector<32x64xf32>
    %c0_62 = arith.constant 0 : index
    %c0_63 = arith.constant 0 : index
    %163 = vector.load %arg9[%c0_62, %c0_63] : memref<1x64xf32, #tpu.memory_space<vmem>>, vector<1x64xf32>
    %164 = vector.broadcast %163 : vector<1x64xf32> to vector<32x64xf32>
    %165 = arith.addf %162, %164 : vector<32x64xf32>
    %cst_64 = arith.constant 0.000000e+00 : f32
    %166 = vector.broadcast %cst_64 : f32 to vector<32x64xf32>
    %167 = arith.maximumf %165, %166 : vector<32x64xf32>
    %c0_65 = arith.constant 0 : index
    %c0_66 = arith.constant 0 : index
    %168 = vector.load %arg10[%c0_65, %c0_66] : memref<64x32xf32, #tpu.memory_space<vmem>>, vector<64x32xf32>
    %cst_67 = arith.constant dense<0.000000e+00> : vector<32x32xf32>
    %169 = tpu.matmul %167, %168, %cst_67 {dimension_numbers = #tpu.dot_dimension_numbers<[1], [0], [0], [1], [0, 0, 1, 1], [], []>} : vector<32x64xf32>, vector<64x32xf32>, vector<32x32xf32> -> vector<32x32xf32>
    %c0_68 = arith.constant 0 : index
    %c0_69 = arith.constant 0 : index
    %170 = vector.load %arg11[%c0_68, %c0_69] : memref<1x32xf32, #tpu.memory_space<vmem>>, vector<1x32xf32>
    %171 = vector.broadcast %170 : vector<1x32xf32> to vector<32x32xf32>
    %172 = arith.addf %169, %171 : vector<32x32xf32>
    %173 = arith.addf %160, %172 : vector<32x32xf32>
    %c0_70 = arith.constant 0 : index
    %c0_71 = arith.constant 0 : index
    %174 = vector.load %arg14[%c0_70, %c0_71] : memref<1x32xf32, #tpu.memory_space<vmem>>, vector<1x32xf32>
    %c0_72 = arith.constant 0 : index
    %c0_73 = arith.constant 0 : index
    %175 = vector.load %arg15[%c0_72, %c0_73] : memref<1x32xf32, #tpu.memory_space<vmem>>, vector<1x32xf32>
    %cst_74 = arith.constant dense<0.000000e+00> : vector<32xf32>
    %176 = vector.multi_reduction <add>, %173, %cst_74 [1] : vector<32x32xf32> to vector<32xf32>
    %177 = vector.shape_cast %176 : vector<32xf32> to vector<32x1xf32>
    %cst_75 = arith.constant 3.200000e+01 : f32
    %178 = vector.broadcast %cst_75 : f32 to vector<32x1xf32>
    %179 = arith.divf %177, %178 : vector<32x1xf32>
    %180 = vector.broadcast %179 : vector<32x1xf32> to vector<32x32xf32>
    %181 = arith.subf %173, %180 : vector<32x32xf32>
    %182 = arith.mulf %181, %181 : vector<32x32xf32>
    %cst_76 = arith.constant dense<0.000000e+00> : vector<32xf32>
    %183 = vector.multi_reduction <add>, %182, %cst_76 [1] : vector<32x32xf32> to vector<32xf32>
    %184 = vector.shape_cast %183 : vector<32xf32> to vector<32x1xf32>
    %cst_77 = arith.constant 3.200000e+01 : f32
    %185 = vector.broadcast %cst_77 : f32 to vector<32x1xf32>
    %186 = arith.divf %184, %185 : vector<32x1xf32>
    %187 = vector.broadcast %179 : vector<32x1xf32> to vector<32x32xf32>
    %188 = arith.subf %173, %187 : vector<32x32xf32>
    %cst_78 = arith.constant 9.99999974E-6 : f32
    %189 = vector.broadcast %cst_78 : f32 to vector<32x1xf32>
    %190 = arith.addf %186, %189 : vector<32x1xf32>
    %191 = math.rsqrt %190 : vector<32x1xf32>
    %192 = vector.broadcast %191 : vector<32x1xf32> to vector<32x32xf32>
    %193 = arith.mulf %188, %192 : vector<32x32xf32>
    %194 = vector.broadcast %174 : vector<1x32xf32> to vector<32x32xf32>
    %195 = arith.mulf %193, %194 : vector<32x32xf32>
    %196 = vector.broadcast %175 : vector<1x32xf32> to vector<32x32xf32>
    %197 = arith.addf %195, %196 : vector<32x32xf32>
    %198 = vector.shape_cast %197 : vector<32x32xf32> to vector<16x2x32xf32>
    %c0_79 = arith.constant 0 : index
    %c0_80 = arith.constant 0 : index
    %c0_81 = arith.constant 0 : index
    %199 = vector.load %arg16[%c0_79, %c0_80, %c0_81] : memref<16x2x32xf32, #tpu.memory_space<vmem>>, vector<16x2x32xf32>
    tpu.vector_store %arg16[%c0_79, %c0_80, %c0_81], %198 {strides = array<i32>} : memref<16x2x32xf32, #tpu.memory_space<vmem>>, vector<16x2x32xf32>,
    return
  }
}

</mosaic_0001>

<bundles_post_ra>
// kernel: tpu_custom_call.1
= control target key start
LH: loop header
LB: loop body
LE: loop exit
PB: predicated region body
PF: predicated region fallthrough
CT: control target
= control target key end

     0   :  { %s6064_s0 = inlined_call_operand.vmem [shape: f32[16,2,32], index: 0, kind: input, shape index: {}]   ;;  %s6065_s1 = inlined_call_operand.vmem [shape: f32[16,2,32], index: 1, kind: input, shape index: {}]   ;;  %s6066_s2 = inlined_call_operand.vmem [shape: f32[32,64], index: 2, kind: input, shape index: {}]   ;;  %s6067_s3 = inlined_call_operand.vmem [shape: f32[1,64], index: 3, kind: input, shape index: {}]   ;;  %s6068_s4 = inlined_call_operand.hbm [shape: f32[32,32], index: 4, kind: input, shape index: {}]   ;;  %s6069_s5 = inlined_call_operand.vmem [shape: f32[1,32], index: 5, kind: input, shape index: {}]   ;;  %s6070_s6 = inlined_call_operand.hbm [shape: f32[32,32], index: 6, kind: input, shape index: {}]   ;;  %s6071_s7 = inlined_call_operand.vmem [shape: f32[1,32], index: 7, kind: input, shape index: {}]   ;;  %s6072_s8 = inlined_call_operand.hbm [shape: f32[32,64], index: 8, kind: input, shape index: {}]   ;;  %s6073_s9 = inlined_call_operand.vmem [shape: f32[1,64], index: 9, kind: input, shape index: {}]   ;;  %s6074_s10 = inlined_call_operand.vmem [shape: f32[64,32], index: 10, kind: input, shape index: {}]   ;;  %s6075_s11 = inlined_call_operand.vmem [shape: f32[1,32], index: 11, kind: input, shape index: {}]   ;;  %s6076_s12 = inlined_call_operand.vmem [shape: f32[1,32], index: 12, kind: input, shape index: {}]   ;;  %s6077_s13 = inlined_call_operand.vmem [shape: f32[1,32], index: 13, kind: input, shape index: {}]   ;;  %s6078_s14 = inlined_call_operand.vmem [shape: f32[1,32], index: 14, kind: input, shape index: {}]   ;;  %s6079_s15 = inlined_call_operand.vmem [shape: f32[1,32], index: 15, kind: input, shape index: {}]   ;;  %s6080_s16 = inlined_call_operand.hbm [shape: f32[16,2,32], index: 16, kind: output, shape index: {}]  }
   0x1   :  { %6082 = sst [smem:[#allocation12_spill]] %s6064_s0 }
   0x2   :  { %21 = vsyncpa [#allocation3], 0 }
   0x3   :  { %22 = vsyncpa [#allocation6], 0 }
   0x4   :  { %23 = vsyncpa [#allocation4], 0  ;;  %s4698_s21 = smov [#allocation5]   ;;  %s4699_s23 = smov [#allocation2]  }
   0x5   :  { %s51_s22 = sshll.u32 %s4698_s21, 4  ;;  %s37_s24 = sshll.u32 %s4699_s23, 4  ;;  %s52_s22 = int_to_ptr.vmem [resolvable:$true] %s51_s22  ;;  %s4804_s24 = int_to_ptr.vmem [resolvable:$true] %s37_s24 }
   0x6   :  { %s4604_s27 = scalar_lea.hbm %s6070_s6, 512 }
   0x7   :  { %p4605_p0 = scmp.ne.s32.totalorder %s6070_s6, %s4604_s27  ;;  %p4608_p1 = scmp.lt.u32.totalorder %s4604_s27, %s6070_s6 }
   0x9   :  { %p4610_p2 = pnand %p4608_p1, %p4605_p0 }
   0xb   :  { %4613 = shalt.err (!%p4610_p2)
}
   0xc   :  { %s4614_s17 = scalar_lea.vmem %s52_s22, 512  ;;  %p4619_p4 = scmp.lt.s32.totalorder %s52_s22, %s52_s22 }
   0xd   :  { %p4615_p3 = scmp.ne.s32.totalorder %s52_s22, %s4614_s17  ;;  %p4620_p5 = scmp.lt.s32.totalorder %s4614_s17, %s4614_s17 }
   0xf   :  { %p4621_p6 = por %p4620_p5, %p4619_p4 }
  0x11   :  { %p4622_p7 = pnand %p4621_p6, %p4615_p3 }
  0x13   :  { %4625 = shalt.err (!%p4622_p7)
}
  0x14   :  { %s4700_s18 = smov 128   ;;  %s4701_s19 = smov 8  }
  0x15   :  { %57 = dma.hbm_to_vmem [thread:$0]  %s6070_s6, 512, %s52_s22, [#allocation6], %s4700_s18, %s4700_s18, %s4701_s19  }
  0x16   :  { %s4626_s26 = scalar_lea.hbm %s6068_s4, 512 }
  0x17   :  { %p4627_p8 = scmp.ne.s32.totalorder %s6068_s4, %s4626_s26  ;;  %p4630_p9 = scmp.lt.u32.totalorder %s4626_s26, %s6068_s4 }
  0x19   :  { %p4632_p10 = pnand %p4630_p9, %p4627_p8 }
  0x1b   :  { %4635 = shalt.err (!%p4632_p10)
}
  0x1c   :  { %s4636_s0 = scalar_lea.vmem %s4804_s24, 512  ;;  %p4641_p12 = scmp.lt.s32.totalorder %s4804_s24, %s4804_s24 }
  0x1d   :  { %p4637_p11 = scmp.ne.s32.totalorder %s4804_s24, %s4636_s0  ;;  %p4642_p13 = scmp.lt.s32.totalorder %s4636_s0, %s4636_s0 }
  0x1f   :  { %p4643_p0 = por %p4642_p13, %p4641_p12 }
  0x21   :  { %p4644_p1 = pnand %p4643_p0, %p4637_p11 }
  0x23   :  { %4647 = shalt.err (!%p4644_p1)
}
  0x24   :  { %43 = dma.hbm_to_vmem [thread:$0]  %s6068_s4, 512, %s4804_s24, [#allocation3], %s4700_s18, %s4700_s18, %s4701_s19  }
  0x25   :  { %s4702_s17 = smov [#allocation7]   ;;  %s4648_s25 = scalar_lea.hbm %s6072_s8, 512 }
  0x26   :  { %s65_s20 = sshll.u32 %s4702_s17, 4  ;;  %p4649_p2 = scmp.ne.s32.totalorder %s6072_s8, %s4648_s25  ;;  %s66_s20 = int_to_ptr.vmem [resolvable:$true] %s65_s20 }
  0x27   :  { %p4652_p3 = scmp.lt.u32.totalorder %s4648_s25, %s6072_s8 }
  0x29   :  { %p4654_p4 = pnand %p4652_p3, %p4649_p2 }
  0x2b   :  { %4657 = shalt.err (!%p4654_p4)
}
  0x2c   :  { %s4658_s30 = scalar_lea.vmem %s66_s20, 512  ;;  %p4663_p6 = scmp.lt.s32.totalorder %s66_s20, %s66_s20 }
  0x2d   :  { %p4659_p5 = scmp.ne.s32.totalorder %s66_s20, %s4658_s30  ;;  %p4664_p7 = scmp.lt.s32.totalorder %s4658_s30, %s4658_s30 }
  0x2f   :  { %p4665_p8 = por %p4664_p7, %p4663_p6 }
  0x31   :  { %p4666_p9 = pnand %p4665_p8, %p4659_p5 }
  0x33   :  { %4669 = shalt.err (!%p4666_p9)
}
  0x34   :  { %71 = dma.hbm_to_vmem [thread:$0]  %s6072_s8, 512, %s66_s20, [#allocation6], %s4700_s18, %s4700_s18, %s4701_s19  }
  0x35   :  { %4692 = dma.done.wait [#allocation3], 512  }
  0x36   :  { %4693 = vsyncadd [#allocation3], 4294966784 }
  0x37   :  { %4694 = dma.done.wait [#allocation6], 1024  }
  0x38   :  { %4695 = vsyncadd [#allocation6], 4294966272  ;;  %v4703_v0 = vmov 1983009808   ;;  %v175_v2 = vlaneseq  ;;  %v143_v3 = vld [vmem:[%s6066_s2] sm:$0xff]  ;;  %v144_v4 = vld [vmem:[%s6066_s2 + $0x8] sm:$0xff] }
  0x39   :  { %v173_v1 = vunpack.c.l.s4 %v4703_v0  ;;  %v145_v5 = vld [vmem:[%s6066_s2 + $0x10] sm:$0xff]  ;;  %v4281_v8 = vpack.c.bf16 %v144_v4, %v143_v3  ;;  %v146_v9 = vld [vmem:[%s6066_s2 + $0x18] sm:$0xff]  ;;  %s6083_s25 = sld [smem:[#allocation12_spill]]  ;;  %vm238_vm0 = vcmask 261120   ;;  %v111_v15 = vld [vmem:[%s6065_s1] sm:$0x3] }
  0x3a   :  { %v4866_v7 = vshrl.u32 %v175_v2, 7  ;;  %v4285_v12 = vpack.c.bf16 %v146_v9, %v145_v5  ;;  %v112_v16 = vld [vmem:[%s6065_s1 + $0x2] sm:$0x3]  ;;  %v113_v17 = vld [vmem:[%s6065_s1 + $0x4] sm:$0x3]  ;;  %vm616_vm1 = vcmask 64512  }
  0x3b   :  { %v174_v6 = vunpack.c.0.s8 %v173_v1  ;;  %4282 = vmatprep.subr.bf16.mxu0 %v4281_v8  ;;  %v114_v18 = vld [vmem:[%s6065_s1 + $0x6] sm:$0x3]  ;;  %v115_v28 = vld [vmem:[%s6065_s1 + $0x8] sm:$0x3]  ;;  %v116_v29 = vld [vmem:[%s6065_s1 + $0xa] sm:$0x3] }
  0x3c   :  { %4284 = vmatpush3.bf16.msra.mxu0 %v4281_v8  ;;  %v117_v32 = vld [vmem:[%s6065_s1 + $0xc] sm:$0x3]  ;;  %v118_v33 = vld [vmem:[%s6065_s1 + $0xe] sm:$0x3]  ;;  %v119_v45 = vld [vmem:[%s6065_s1 + $0x10] sm:$0x3] }
  0x3d   :  { %v4908_v23 = vsub.s32 %v174_v6, %v4866_v7  ;;  %4286 = vmatprep.subr.bf16.mxu0 %v4285_v12  ;;  %v120_v46 = vld [vmem:[%s6065_s1 + $0x12] sm:$0x3]  ;;  %v121_v47 = vld [vmem:[%s6065_s1 + $0x14] sm:$0x3]  ;;  %v122_v49 = vld [vmem:[%s6065_s1 + $0x16] sm:$0x3] }
  0x3e   :  { %v123_v60 = vld [vmem:[%s6065_s1 + $0x18] sm:$0x3]  ;;  %v124_v63 = vld [vmem:[%s6065_s1 + $0x1a] sm:$0x3]  ;;  %v125_v0 = vld [vmem:[%s6065_s1 + $0x1c] sm:$0x3] }
  0x3f   :  { %v4874_v10 = vld [vmem:[%s6083_s25] sm:$0x3]  ;;  %v4879_v11 = vld [vmem:[%s6083_s25 + $0x2] sm:$0x3]  ;;  %v4884_v13 = vld [vmem:[%s6083_s25 + $0x4] sm:$0x3] }
  0x40   :  { %v4889_v14 = vld [vmem:[%s6083_s25 + $0x6] sm:$0x3]  ;;  %v127_v19 = vadd.f32 %v111_v15, %v4874_v10  ;;  %v128_v20 = vadd.f32 %v112_v16, %v4879_v11  ;;  %v129_v21 = vadd.f32 %v113_v17, %v4884_v13  ;;  %v4913_v24 = vld [vmem:[%s6083_s25 + $0x8] sm:$0x3]  ;;  %v4918_v25 = vld [vmem:[%s6083_s25 + $0xa] sm:$0x3]  ;;  %4288 = vmatpush3.bf16.msra.mxu0 %v4285_v12 }
  0x41   :  { %v130_v22 = vadd.f32 %v114_v18, %v4889_v14  ;;  %v4923_v26 = vld [vmem:[%s6083_s25 + $0xc] sm:$0x3]  ;;  %v4928_v27 = vld [vmem:[%s6083_s25 + $0xe] sm:$0x3]  ;;  %v131_v34 = vadd.f32 %v115_v28, %v4913_v24  ;;  %v132_v35 = vadd.f32 %v116_v29, %v4918_v25  ;;  %v4947_v36 = vld [vmem:[%s6083_s25 + $0x10] sm:$0x3] }
  0x42   :  { %v170_v30 = vcombine.low %v127_v19, %v128_v20  ;;  %v133_v37 = vadd.f32 %v117_v32, %v4923_v26  ;;  %v134_v38 = vadd.f32 %v118_v33, %v4928_v27  ;;  %v4954_v39 = vld [vmem:[%s6083_s25 + $0x12] sm:$0x3]  ;;  %v4959_v40 = vld [vmem:[%s6083_s25 + $0x14] sm:$0x3]  ;;  %v4964_v41 = vld [vmem:[%s6083_s25 + $0x16] sm:$0x3]  ;;  %v135_v50 = vadd.f32 %v119_v45, %v4947_v36 }
  0x43   :  { %v171_v31 = vcombine.low %v129_v21, %v130_v22  ;;  %v187_v44 = vcombine.low %v131_v34, %v132_v35  ;;  %v136_v51 = vadd.f32 %v120_v46, %v4954_v39  ;;  %v137_v52 = vadd.f32 %v121_v47, %v4959_v40  ;;  %v4986_v53 = vld [vmem:[%s6083_s25 + $0x18] sm:$0x3]  ;;  %v4991_v54 = vld [vmem:[%s6083_s25 + $0x1a] sm:$0x3]  ;;  %v4998_v58 = vld [vmem:[%s6083_s25 + $0x1c] sm:$0x3] }
  0x44   :  { %v178_v42 = vrot.slane %v170_v30, %v4908_v23  ;;  %v188_v48 = vcombine.low %v133_v37, %v134_v38  ;;  %v138_v57 = vadd.f32 %v122_v49, %v4964_v41  ;;  %v5003_v59 = vld [vmem:[%s6083_s25 + $0x1e] sm:$0x3]  ;;  %v139_v3 = vadd.f32 %v123_v60, %v4986_v53  ;;  %v3864_v22 = vld [vmem:[%s6067_s3] ss:$0 sm:$0xff]  ;;  %s4704_s6 = smov 88   ;;  %s4705_s22 = smov 96   ;;  %vm5061_vm2 = vmpackc.low %vm616_vm1, %vm616_vm1 }
  0x45   :  { %v185_v43 = vrot.slane %v171_v31, %v4908_v23  ;;  %v195_v56 = vrot.slane %v187_v44, %v4908_v23  ;;  %v204_v62 = vcombine.low %v135_v50, %v136_v51  ;;  %v126_v1 = vld [vmem:[%s6065_s1 + $0x1e] sm:$0x3]  ;;  %v140_v5 = vadd.f32 %v124_v63, %v4991_v54  ;;  %s4706_s3 = smov 120   ;;  %s4708_s23 = smov 80  }
  0x46   :  { %v202_v61 = vrot.slane %v188_v48, %v4908_v23  ;;  %v205_v4 = vcombine.low %v137_v52, %v138_v57  ;;  %v141_v6 = vadd.f32 %v125_v0, %v4998_v58  ;;  %v142_v8 = vadd.f32 %v126_v1, %v5003_v59  ;;  %s4710_s8 = smov 72   ;;  %s4711_s18 = smov 104  }
  0x47   :  { %v186_v55 = vcombine.low %v178_v42, %v185_v43  ;;  %v212_v12 = vrot.slane %v204_v62, %v4908_v23  ;;  %v221_v16 = vcombine.low %v139_v3, %v140_v5  ;;  %vm3013_vm7 = vcmask 523264  }
  0x48   :  { %v203_v9 = vcombine.low %v195_v56, %v202_v61  ;;  %v219_v15 = vrot.slane %v205_v4, %v4908_v23  ;;  %v222_v17 = vcombine.low %v141_v6, %v142_v8  ;;  %vm3829_vm8 = vcmask 254976  }
  0x49   :  { %4081 = vmatprep.mubr.msk.f32.mxu0 %vm238_vm0, %v186_v55  ;;  %v229_v19 = vrot.slane %v221_v16, %v4908_v23  ;;  %v363_v16 = vcombine.low %v4874_v10, %v4879_v11 }
  0x4a   :  { %4082 = vmatmul.mubr.msk.f32.vlgmr.msra.gmra.mrb[0].mxu0 %vm238_vm0, %v203_v9  ;;  %v220_v18 = vcombine.low %v212_v12, %v219_v15  ;;  %v236_v20 = vrot.slane %v222_v17, %v4908_v23  ;;  %v336_v9 = vld [vmem:[#allocation2] sm:$0xff]  ;;  %v337_v12 = vld [vmem:[#allocation2 + $0x8] sm:$0xff]  ;;  %v338_v15 = vld [vmem:[#allocation2 + $0x10] sm:$0xff]  ;;  %v364_v17 = vcombine.low %v4884_v13, %v4889_v14 }
  0x4b   :  { %v371_v10 = vrot.slane %v363_v16, %v4908_v23 }
  0x4c   :  { %4084 = vmatprep.mubr.msk.f32.mxu0 %vm238_vm0, %v220_v18  ;;  %v237_v21 = vcombine.low %v229_v19, %v236_v20  ;;  %v380_v18 = vcombine.low %v4913_v24, %v4918_v25  ;;  %v381_v19 = vcombine.low %v4923_v26, %v4928_v27  ;;  %v4289_v20 = vpack.c.bf16 %v337_v12, %v336_v9 }
  0x4d   :  { %v378_v11 = vrot.slane %v364_v17, %v4908_v23  ;;  %v414_v24 = vcombine.low %v4986_v53, %v4991_v54  ;;  %v415_v25 = vcombine.low %v4998_v58, %v5003_v59  ;;  %v526_v54 = vadd.s32 8, %v4866_v7 }
  0x4e   :  { %4085 = vmatmul.mubr.msk.f32.gmra.mrb[2].mxu0 %vm238_vm0, %v237_v21  ;;  %v339_v21 = vld [vmem:[#allocation2 + $0x18] sm:$0xff]  ;;  %4290 = vmatprep.subr.bf16.mxu1 %v4289_v20  ;;  %v388_v13 = vrot.slane %v380_v18, %v4908_v23  ;;  %v395_v14 = vrot.slane %v381_v19, %v4908_v23  ;;  %v578_v58 = vand.u32 127, %v175_v2 }
  0x4f   :  { %4292 = vmatpush3.bf16.msra.mxu1 %v4289_v20  ;;  %v379_v26 = vcombine.low %v371_v10, %v378_v11  ;;  %v540_v59 = vand.u32 1, %v526_v54 }
  0x51   :  { %4095 = vmatprep.mubr.msk.f32.mxu1 %vm238_vm0, %v379_v26 }
 0x11d   :  { %v4083_v28 = vpop.f32.mrb[0].mxu0 }
 0x11e   :  { %v319_v29 = vadd.f32 %v4083_v28, %v3864_v22  ;;  %v313_v30 = vpop.f32.mrb[1].mxu0  ;;  %v398_v28 = vcombine.low %v4959_v40, %v4964_v41  ;;  %v422_v40 = vrot.slane %v414_v24, %v4908_v23  ;;  %v429_v41 = vrot.slane %v415_v25, %v4908_v23 }
 0x11f   :  { %v314_v31 = vadd.f32 %v3864_v22, %v313_v30 }
 0x120   :  { %v5045_v43 = vmul.f32 0.35355338, %v319_v29  ;;  %v430_v53 = vcombine.low %v422_v40, %v429_v41  ;;  %v3869_v40 = vld [vmem:[%s6069_s5] ss:$0 sm:$0xff]  ;;  %s4709_s5 = smov 112  }
 0x121   :  { %v5033_v32 = vpack.i.bf16 %v319_v29, %v314_v31  ;;  %v5035_v33 = vmul.f32 0.35355338, %v314_v31  ;;  %v4086_v34 = vpop.f32.mrb[2].mxu0  ;;  %v4293_v29 = vpack.c.bf16 %v339_v21, %v338_v15  ;;  %v583_v31 = vand.u32 1, %v578_v58 }
 0x122   :  { %v329_v35 = vadd.f32 %v4086_v34, %v3864_v22  ;;  %v323_v37 = vpop.f32.mrb[3].mxu0  ;;  %v533_v34 = vand.u32 1, %v4866_v7 }
 0x123   :  { %4449 = vrot.lane.b32.xlu1 %v5033_v32, %s4704_s6  ;;  %4439 = vrot.lane.b32.xlu0 %v5033_v32, %s4705_s22  ;;  %v324_v38 = vadd.f32 %v3864_v22, %v323_v37  ;;  %v397_v22 = vcombine.low %v4947_v36, %v4954_v39  ;;  %v412_v36 = vrot.slane %v398_v28, %v4908_v23  ;;  %v528_v37 = vadd.s32 24, %v4866_v7 }
 0x124   :  { %4109 = vmatprep.mubr.msk.f32.mxu0 %vm616_vm1, %v5035_v33  ;;  %v5051_v44 = vmul.f32 0.35355338, %v329_v35  ;;  %4294 = vmatprep.subr.bf16.mxu1 %v4293_v29  ;;  %v396_v39 = vcombine.low %v388_v13, %v395_v14  ;;  %vm592_vm3 = vcmp.eq.s32.totalorder %v540_v59, %v583_v31  ;;  %vm591_vm4 = vcmp.eq.s32.totalorder %v533_v34, %v583_v31 }
 0x125   :  { %v5041_v42 = vpack.i.bf16 %v329_v35, %v324_v38  ;;  %v5053_v45 = vmul.f32 0.35355338, %v324_v38  ;;  %v405_v27 = vrot.slane %v397_v22, %v4908_v23  ;;  %4296 = vmatpush3.bf16.msra.mxu1 %v4293_v29  ;;  %v527_v35 = vadd.s32 16, %v4866_v7 }
 0x127   :  { %4454 = vrot.lane.b32.xlu1 %v5041_v42, %s4704_s6  ;;  %4444 = vrot.lane.b32.xlu0 %v5041_v42, %s4705_s22  ;;  %v413_v30 = vcombine.low %v405_v27, %v412_v36  ;;  %v547_v38 = vand.u32 1, %v527_v35 }
 0x128   :  { %4096 = vmatmul.mubr.msk.f32.vlgmr.msra.gmra.mrb[0].mxu1 %vm238_vm0, %v396_v39 }
 0x129   :  { %4098 = vmatprep.mubr.msk.f32.mxu1 %vm238_vm0, %v413_v30  ;;  %vm593_vm5 = vcmp.eq.s32.totalorder %v547_v38, %v583_v31 }
 0x12b   :  { %972 = vrot.lane.b32.xlu1 %v5045_v43, %s4706_s3  ;;  %970 = vrot.lane.b32.xlu0 %v5035_v33, %s4706_s3 }
 0x12c   :  { %4099 = vmatmul.mubr.msk.f32.gmra.mrb[2].mxu1 %vm238_vm0, %v430_v53 }
 0x12f   :  { %976 = vrot.lane.b32.xlu1 %v5051_v44, %s4706_s3  ;;  %974 = vrot.lane.b32.xlu0 %v5053_v45, %s4706_s3 }
 0x195   :  { %v4440_v46 = vpop.permute.xlu0 %4439  ;;  %v4450_v52 = vpop.permute.xlu1 %4449 }
 0x196   :  { %v4442_v47 = vunpack.i.h.bf16 %v4440_v46  ;;  %v4441_v48 = vunpack.i.l.bf16 %v4440_v46  ;;  %v4452_v60 = vunpack.i.h.bf16 %v4450_v52  ;;  %v4451_v61 = vunpack.i.l.bf16 %v4450_v52 }
 0x197   :  { %v4707_v46 = vmov -1e+30  }
 0x198   :  { %v4297_v50 = vpack.c.bf16 %v4442_v47, %v4441_v48  ;;  %v4317_v62 = vpack.c.bf16 %v4452_v60, %v4451_v61  ;;  %v5124_v47 = vsel %vm592_vm3, 0.0, %v4707_v46  ;;  %v554_v48 = vand.u32 1, %v528_v37 }
 0x199   :  { %v4445_v51 = vpop.permute.xlu0 %4444  ;;  %v4455_v63 = vpop.permute.xlu1 %4454 }
 0x19a   :  { %4299 = vmatprep.subr.msk.bf16.mxu0 %vm5061_vm2, %v4297_v50  ;;  %v4447_v55 = vunpack.i.h.bf16 %v4445_v51  ;;  %v4446_v56 = vunpack.i.l.bf16 %v4445_v51  ;;  %v4457_v0 = vunpack.i.h.bf16 %v4455_v63  ;;  %v4456_v1 = vunpack.i.l.bf16 %v4455_v63 }
 0x19b   :  { %4302 = vmatpush3.bf16.xpose.msk.msra.mxu0 %vm5061_vm2, %v4297_v50  ;;  %v5126_v50 = vsel %vm591_vm4, 0.0, %v4707_v46  ;;  %vm594_vm6 = vcmp.eq.s32.totalorder %v554_v48, %v583_v31 }
 0x19c   :  { %v4303_v57 = vpack.c.bf16 %v4447_v55, %v4446_v56  ;;  %v4323_v3 = vpack.c.bf16 %v4457_v0, %v4456_v1 }
 0x19d   :  { %v971_v4 = vpop.permute.xlu0 %970  ;;  %v973_v5 = vpop.permute.xlu1 %972 }
 0x19e   :  { %4305 = vmatprep.subr.msk.bf16.mxu0 %vm5061_vm2, %v4303_v57 }
 0x1a1   :  { %v975_v6 = vpop.permute.xlu0 %974  ;;  %v977_v8 = vpop.permute.xlu1 %976 }
 0x1a3   :  { %4308 = vmatpush3.bf16.xpose.msk.msra.mxu0 %vm5061_vm2, %v4303_v57  ;;  %v5131_v57 = vsel %vm593_vm5, 0.0, %v4707_v46 }
 0x1a4   :  { %4319 = vmatprep.subr.msk.bf16.mxu0 %vm5061_vm2, %v4317_v62 }
 0x1aa   :  { %4110 = vmatmul.mubr.msk.f32.vlgmr.msra.gmra.mrb[4].mxu0 %vm616_vm1, %v5045_v43 }
 0x1ab   :  { %4112 = vmatprep.mubr.msk.f32.mxu0 %vm616_vm1, %v5053_v45  ;;  %4322 = vmatpush3.bf16.xpose.msk.msra.mxu0 %vm5061_vm2, %v4317_v62  ;;  %v5134_v62 = vsel %vm594_vm6, 0.0, %v4707_v46 }
 0x1ac   :  { %4325 = vmatprep.subr.msk.bf16.mxu0 %vm5061_vm2, %v4323_v3 }
 0x1ae   :  { %4113 = vmatmul.mubr.msk.f32.gmra.mrb[6].mxu0 %vm616_vm1, %v5051_v44 }
 0x1af   :  { %4145 = vmatprep.mubr.msk.f32.mxu0 %vm616_vm1, %v971_v4 }
 0x1b3   :  { %4328 = vmatpush3.bf16.xpose.msk.msra.mxu0 %vm5061_vm2, %v4323_v3 }
 0x1ba   :  { %4146 = vmatmul.mubr.msk.f32.vlgmr.msra.gmra.mrb[8].mxu0 %vm616_vm1, %v973_v5 }
 0x1bb   :  { %4148 = vmatprep.mubr.msk.f32.mxu0 %vm616_vm1, %v975_v6 }
 0x1be   :  { %4149 = vmatmul.mubr.msk.f32.gmra.mrb[10].mxu0 %vm616_vm1, %v977_v8 }
 0x1fb   :  { %v4097_v39 = vpop.f32.mrb[0].mxu1 }
 0x1fc   :  { %v505_v41 = vpop.f32.mrb[1].mxu1  ;;  %v5156_v30 = vadd.f32 %v4097_v39, %v3869_v40 }
 0x1fd   :  { %v5158_v53 = vadd.f32 %v3869_v40, %v505_v41 }
 0x1ff   :  { %v4100_v54 = vpop.f32.mrb[2].mxu1  ;;  %v4309_v58 = vpack.c.bf16 %v5156_v30, %v5158_v53 }
 0x200   :  { %v515_v59 = vpop.f32.mrb[3].mxu1  ;;  %v5163_v31 = vadd.f32 %v4100_v54, %v3869_v40 }
 0x201   :  { %v5165_v34 = vadd.f32 %v3869_v40, %v515_v59  ;;  %4310 = vmatprep.subr.bf16.mxu1 %v4309_v58 }
 0x202   :  { %4312 = vmatpush3.bf16.msra.mxu1 %v4309_v58 }
 0x203   :  { %v4313_v35 = vpack.c.bf16 %v5163_v31, %v5165_v34 }
 0x205   :  { %4314 = vmatprep.subr.bf16.mxu1 %v4313_v35 }
 0x206   :  { %4316 = vmatpush3.bf16.msra.mxu1 %v4313_v35 }
 0x27d   :  { %v4111_v51 = vpop.f32.mrb[4].mxu0 }
 0x27e   :  { %v709_v2 = vadd.f32 %v4111_v51, %v5124_v47  ;;  %v703_v52 = vpop.f32.mrb[5].mxu0 }
 0x27f   :  { %v704_v55 = vadd.f32 %v703_v52, %v5126_v50 }
 0x280   :  { %v725_v56 = vsel %vm238_vm0, %v709_v2, -inf }
 0x281   :  { %726 = vmax.xlane.f32.xlu1 %v725_v56  ;;  %v4114_v60 = vpop.f32.mrb[6].mxu0  ;;  %v722_v61 = vsel %vm238_vm0, %v704_v55, -inf }
 0x282   :  { %v713_v63 = vpop.f32.mrb[7].mxu0  ;;  %723 = vmax.xlane.f32.xlu0 %v722_v61  ;;  %v719_v1 = vadd.f32 %v4114_v60, %v5134_v62 }
 0x283   :  { %v714_v0 = vadd.f32 %v713_v63, %v5131_v57 }
 0x284   :  { %v731_v4 = vsel %vm238_vm0, %v719_v1, -inf }
 0x285   :  { %v728_v3 = vsel %vm238_vm0, %v714_v0, -inf }
 0x286   :  { %729 = vmax.xlane.f32.xlu0 %v728_v3 }
 0x28a   :  { %732 = vmax.xlane.f32.xlu0 %v731_v4 }
 0x28d   :  { %v4147_v5 = vpop.f32.mrb[8].mxu0 }
 0x28e   :  { %v1068_v6 = vpop.f32.mrb[9].mxu0  ;;  %v1074_v38 = vadd.f32 %v4147_v5, %v5124_v47 }
 0x28f   :  { %v1069_v37 = vadd.f32 %v1068_v6, %v5126_v50 }
 0x291   :  { %v4150_v8 = vpop.f32.mrb[10].mxu0  ;;  %v1087_v48 = vsel %vm238_vm0, %v1069_v37, -inf }
 0x292   :  { %v1078_v9 = vpop.f32.mrb[11].mxu0  ;;  %v1084_v51 = vadd.f32 %v4150_v8, %v5134_v62 }
 0x293   :  { %v1079_v46 = vadd.f32 %v1078_v9, %v5131_v57 }
 0x295   :  { %v1093_v52 = vsel %vm238_vm0, %v1079_v46, -inf }
 0x30e   :  { %v727_v12 = vpop.xlane.xlu1 %726 }
 0x30f   :  { %v735_v15 = vsub.f32 %v709_v2, %v727_v12  ;;  %v724_v16 = vpop.xlane.xlu0 %723  ;;  %v1090_v2 = vsel %vm238_vm0, %v1074_v38, -inf }
 0x310   :  { %v734_v17 = vsub.f32 %v704_v55, %v724_v16  ;;  %v1096_v55 = vsel %vm238_vm0, %v1084_v51, -inf }
 0x311   :  { %v740_v18 = vmul.f32 1.442695, %v735_v15 }
 0x312   :  { %v738_v19 = vmul.f32 1.442695, %v734_v17 }
 0x313   :  { %4508 = vpow2.f32 %v740_v18  ;;  %v730_v20 = vpop.xlane.xlu0 %729 }
 0x314   :  { %4510 = vpow2.f32 %v738_v19  ;;  %v736_v21 = vsub.f32 %v714_v0, %v730_v20 }
 0x316   :  { %v742_v22 = vmul.f32 1.442695, %v736_v21 }
 0x317   :  { %v733_v28 = vpop.xlane.xlu0 %732 }
 0x318   :  { %4512 = vpow2.f32 %v742_v22  ;;  %v737_v29 = vsub.f32 %v719_v1, %v733_v28 }
 0x31a   :  { %v744_v10 = vmul.f32 1.442695, %v737_v29 }
 0x31c   :  { %4514 = vpow2.f32 %v744_v10 }
 0x31d   :  { %v5140_v11 = vpop.eup %4508 }
 0x31e   :  { %v4511_v13 = vpop.eup %4510  ;;  %v749_v14 = vsel %vm238_vm0, %v5140_v11, 0.0 }
 0x31f   :  { %750 = vadd.xlane.f32.xlu0 %v749_v14  ;;  %v746_v24 = vsel %vm238_vm0, %v4511_v13, 0.0 }
 0x320   :  { %747 = vadd.xlane.f32.xlu1 %v746_v24 }
 0x322   :  { %v5145_v25 = vpop.eup %4512 }
 0x323   :  { %v752_v26 = vsel %vm238_vm0, %v5145_v25, 0.0 }
 0x324   :  { %753 = vadd.xlane.f32.xlu1 %v752_v26 }
 0x326   :  { %v5149_v27 = vpop.eup %4514 }
 0x327   :  { %v755_v36 = vsel %vm238_vm0, %v5149_v27, 0.0 }
 0x328   :  { %756 = vadd.xlane.f32.xlu0 %v755_v36 }
 0x335   :  { %4459 = vrot.lane.b32.xlu1 %v5033_v32, %s4708_s23 }
 0x339   :  { %1345 = vrot.lane.b32.xlu1 %v5035_v33, %s4709_s5 }
 0x33d   :  { %1347 = vrot.lane.b32.xlu1 %v5045_v43, %s4709_s5 }
 0x33e   :  { %4464 = vrot.lane.b32.xlu0 %v5041_v42, %s4708_s23 }
 0x341   :  { %1351 = vrot.lane.b32.xlu1 %v5051_v44, %s4709_s5 }
 0x342   :  { %1349 = vrot.lane.b32.xlu0 %v5053_v45, %s4709_s5 }
 0x361   :  { %1088 = vmax.xlane.f32.xlu0 %v1087_v48 }
 0x365   :  { %1091 = vmax.xlane.f32.xlu1 %v1090_v2  ;;  %1094 = vmax.xlane.f32.xlu0 %v1093_v52  ;;  %v599_v2 = vld [vmem:[#allocation5] sm:$0xff]  ;;  %v5220_v52 = vpack.i.bf16 %v5156_v30, %v5158_v53 }
 0x366   :  { %4129 = vmatprep.subr.mxu1 %v599_v2 }
 0x369   :  { %1097 = vmax.xlane.f32.xlu0 %v1096_v55  ;;  %v5227_v55 = vpack.i.bf16 %v5163_v31, %v5165_v34 }
 0x3ac   :  { %v751_v56 = vpop.xlane.xlu0 %750 }
 0x3ad   :  { %4516 = vrcp.f32 %v751_v56  ;;  %v748_v60 = vpop.xlane.xlu1 %747 }
 0x3ae   :  { %4518 = vrcp.f32 %v748_v60 }
 0x3b1   :  { %v754_v61 = vpop.xlane.xlu1 %753 }
 0x3b2   :  { %4520 = vrcp.f32 %v754_v61 }
 0x3b5   :  { %v4460_v63 = vpop.permute.xlu1 %4459  ;;  %v757_v0 = vpop.xlane.xlu0 %756 }
 0x3b6   :  { %v4462_v1 = vunpack.i.h.bf16 %v4460_v63  ;;  %v4461_v3 = vunpack.i.l.bf16 %v4460_v63  ;;  %4522 = vrcp.f32 %v757_v0 }
 0x3b7   :  { %v4517_v4 = vpop.eup %4516 }
 0x3b8   :  { %v4519_v5 = vpop.eup %4518  ;;  %v4337_v6 = vpack.c.bf16 %v4462_v1, %v4461_v3  ;;  %v763_v15 = vmul.f32 %v4517_v4, %v5140_v11 }
 0x3b9   :  { %v1346_v8 = vpop.permute.xlu1 %1345  ;;  %v4465_v9 = vpop.permute.xlu0 %4464  ;;  %v762_v12 = vmul.f32 %v4519_v5, %v4511_v13 }
 0x3ba   :  { %v4467_v16 = vunpack.i.h.bf16 %v4465_v9  ;;  %v4466_v17 = vunpack.i.l.bf16 %v4465_v9  ;;  %4339 = vmatprep.subr.msk.bf16.mxu0 %vm5061_vm2, %v4337_v6  ;;  %4181 = vmatprep.mubr.msk.f32.mxu0 %vm616_vm1, %v1346_v8 }
 0x3bb   :  { %4123 = vmatprep.mubr.msk.f32.mxu1 %vm238_vm0, %v762_v12  ;;  %4342 = vmatpush3.bf16.xpose.msk.msra.mxu0 %vm5061_vm2, %v4337_v6 }
 0x3bc   :  { %v4521_v18 = vpop.eup %4520  ;;  %v4343_v19 = vpack.c.bf16 %v4467_v16, %v4466_v17  ;;  %4124 = vmatmul.mubr.msk.f32.vlgmr.msra.gmra.mrb[4].mxu1 %vm238_vm0, %v763_v15 }
 0x3bd   :  { %v764_v20 = vmul.f32 %v4521_v18, %v5145_v25  ;;  %v1348_v28 = vpop.permute.xlu1 %1347  ;;  %v1350_v29 = vpop.permute.xlu0 %1349  ;;  %4130 = vmatpush3.msra.mxu1 %v599_v2 }
 0x3be   :  { %4345 = vmatprep.subr.msk.bf16.mxu0 %vm5061_vm2, %v4343_v19 }
 0x3bf   :  { %4126 = vmatprep.mubr.msk.f32.mxu1 %vm238_vm0, %v764_v20 }
 0x3c0   :  { %v4523_v21 = vpop.eup %4522 }
 0x3c1   :  { %v765_v22 = vmul.f32 %v4523_v21, %v5149_v27  ;;  %v1352_v10 = vpop.permute.xlu1 %1351 }
 0x3c3   :  { %4127 = vmatmul.mubr.msk.f32.gmra.mrb[6].mxu1 %vm238_vm0, %v765_v22  ;;  %4348 = vmatpush3.bf16.xpose.msk.msra.mxu0 %vm5061_vm2, %v4343_v19 }
 0x3ca   :  { %4182 = vmatmul.mubr.msk.f32.vlgmr.msra.gmra.mrb[12].mxu0 %vm616_vm1, %v1348_v28 }
 0x3cb   :  { %4184 = vmatprep.mubr.msk.f32.mxu0 %vm616_vm1, %v1350_v29 }
 0x3ce   :  { %4185 = vmatmul.mubr.msk.f32.gmra.mrb[14].mxu0 %vm616_vm1, %v1352_v10 }
 0x3ee   :  { %v1089_v11 = vpop.xlane.xlu0 %1088 }
 0x3ef   :  { %v1099_v13 = vsub.f32 %v1069_v37, %v1089_v11 }
 0x3f1   :  { %v1103_v14 = vmul.f32 1.442695, %v1099_v13 }
 0x3f2   :  { %v1092_v24 = vpop.xlane.xlu1 %1091  ;;  %v1095_v25 = vpop.xlane.xlu0 %1094 }
 0x3f3   :  { %4524 = vpow2.f32 %v1103_v14  ;;  %v1100_v26 = vsub.f32 %v1074_v38, %v1092_v24  ;;  %v1101_v27 = vsub.f32 %v1079_v46, %v1095_v25 }
 0x3f5   :  { %v1105_v36 = vmul.f32 1.442695, %v1100_v26  ;;  %v1107_v39 = vmul.f32 1.442695, %v1101_v27 }
 0x3f6   :  { %v1098_v40 = vpop.xlane.xlu0 %1097 }
 0x3f7   :  { %4526 = vpow2.f32 %v1105_v36  ;;  %v1102_v41 = vsub.f32 %v1084_v51, %v1098_v40 }
 0x3f8   :  { %4528 = vpow2.f32 %v1107_v39 }
 0x3f9   :  { %v1109_v54 = vmul.f32 1.442695, %v1102_v41 }
 0x3fb   :  { %4530 = vpow2.f32 %v1109_v54 }
 0x3fd   :  { %v4525_v58 = vpop.eup %4524 }
 0x3fe   :  { %v1111_v59 = vsel %vm238_vm0, %v4525_v58, 0.0 }
 0x3ff   :  { %1112 = vadd.xlane.f32.xlu1 %v1111_v59 }
 0x401   :  { %v5206_v35 = vpop.eup %4526 }
 0x402   :  { %v5208_v37 = vpop.eup %4528  ;;  %v1114_v38 = vsel %vm238_vm0, %v5206_v35, 0.0 }
 0x403   :  { %1115 = vadd.xlane.f32.xlu0 %v1114_v38  ;;  %v1117_v46 = vsel %vm238_vm0, %v5208_v37, 0.0 }
 0x404   :  { %1118 = vadd.xlane.f32.xlu1 %v1117_v46 }
 0x405   :  { %v5214_v48 = vpop.eup %4530 }
 0x406   :  { %v1120_v51 = vsel %vm238_vm0, %v5214_v48, 0.0 }
 0x407   :  { %1121 = vadd.xlane.f32.xlu0 %v1120_v51 }
 0x415   :  { %4469 = vrot.lane.b32.xlu1 %v5220_v52, %s4706_s3 }
 0x419   :  { %4479 = vrot.lane.b32.xlu1 %v5033_v32, %s4710_s8 }
 0x41d   :  { %4484 = vrot.lane.b32.xlu1 %v5041_v42, %s4710_s8  ;;  %4474 = vrot.lane.b32.xlu0 %v5227_v55, %s4706_s3 }
 0x421   :  { %1718 = vrot.lane.b32.xlu1 %v5045_v43, %s4711_s18  ;;  %1716 = vrot.lane.b32.xlu0 %v5035_v33, %s4711_s18 }
 0x425   :  { %1722 = vrot.lane.b32.xlu1 %v5051_v44, %s4711_s18  ;;  %1720 = vrot.lane.b32.xlu0 %v5053_v45, %s4711_s18 }
 0x48c   :  { %v1113_v32 = vpop.xlane.xlu1 %1112 }
 0x48d   :  { %4532 = vrcp.f32 %v1113_v32 }
 0x48f   :  { %v4125_v30 = vpop.f32.mrb[4].mxu1 }
 0x490   :  { %v844_v42 = vpop.f32.mrb[5].mxu1  ;;  %v1116_v53 = vpop.xlane.xlu0 %1115 }
 0x491   :  { %v1119_v31 = vpop.xlane.xlu1 %1118  ;;  %4131 = vmatprep.mubr.msk.f32.mxu1 %vm616_vm1, %v844_v42  ;;  %4534 = vrcp.f32 %v1116_v53 }
 0x492   :  { %4132 = vmatmul.mubr.msk.f32.vlgmr.msra.gmra.mrb[8].mxu1 %vm616_vm1, %v4125_v30  ;;  %4536 = vrcp.f32 %v1119_v31 }
 0x494   :  { %v1122_v43 = vpop.xlane.xlu0 %1121 }
 0x495   :  { %v4470_v33 = vpop.permute.xlu1 %4469  ;;  %4538 = vrcp.f32 %v1122_v43 }
 0x496   :  { %v4472_v34 = vunpack.i.h.bf16 %v4470_v33  ;;  %v4471_v56 = vunpack.i.l.bf16 %v4470_v33  ;;  %v4128_v44 = vpop.f32.mrb[6].mxu1 }
 0x497   :  { %v4533_v60 = vpop.eup %4532  ;;  %v854_v45 = vpop.f32.mrb[7].mxu1 }
 0x498   :  { %v4329_v61 = vpack.c.bf16 %v4472_v34, %v4471_v56  ;;  %4134 = vmatprep.mubr.msk.f32.mxu1 %vm616_vm1, %v854_v45  ;;  %v4475_v63 = vpop.permute.xlu0 %4474  ;;  %v1127_v0 = vmul.f32 %v4533_v60, %v4525_v58 }
 0x499   :  { %v4480_v1 = vpop.permute.xlu1 %4479  ;;  %v4477_v3 = vunpack.i.h.bf16 %v4475_v63  ;;  %v4476_v4 = vunpack.i.l.bf16 %v4475_v63  ;;  %4135 = vmatmul.mubr.msk.f32.gmra.mrb[10].mxu1 %vm616_vm1, %v4128_v44 }
 0x49a   :  { %v4482_v5 = vunpack.i.h.bf16 %v4480_v1  ;;  %v4481_v6 = vunpack.i.l.bf16 %v4480_v1  ;;  %4330 = vmatprep.subr.bf16.mxu1 %v4329_v61  ;;  %4159 = vmatprep.mubr.msk.f32.mxu1 %vm238_vm0, %v1127_v0 }
 0x49b   :  { %v4333_v8 = vpack.c.bf16 %v4477_v3, %v4476_v4  ;;  %4332 = vmatpush3.bf16.msra.mxu1 %v4329_v61  ;;  %v4535_v15 = vpop.eup %4534 }
 0x49c   :  { %v4357_v9 = vpack.c.bf16 %v4482_v5, %v4481_v6  ;;  %v1717_v12 = vpop.permute.xlu0 %1716  ;;  %v4537_v18 = vpop.eup %4536  ;;  %v1128_v29 = vmul.f32 %v4535_v15, %v5206_v35  ;;  %v600_v35 = vld [vmem:[#allocation5 + $0x8] sm:$0xff] }
 0x49d   :  { %v4485_v16 = vpop.permute.xlu1 %4484  ;;  %4334 = vmatprep.subr.bf16.mxu1 %v4333_v8  ;;  %v4183_v17 = vpop.f32.mrb[12].mxu0  ;;  %4217 = vmatprep.mubr.msk.f32.mxu0 %vm616_vm1, %v1717_v12  ;;  %v1129_v24 = vmul.f32 %v4537_v18, %v5208_v37 }
 0x49e   :  { %v4487_v19 = vunpack.i.h.bf16 %v4485_v16  ;;  %v4486_v20 = vunpack.i.l.bf16 %v4485_v16  ;;  %v1449_v21 = vadd.f32 %v4183_v17, %v5124_v47  ;;  %4359 = vmatprep.subr.msk.bf16.mxu0 %vm5061_vm2, %v4357_v9  ;;  %v1443_v22 = vpop.f32.mrb[13].mxu0 }
 0x49f   :  { %4336 = vmatpush3.bf16.msra.mxu1 %v4333_v8  ;;  %v1444_v28 = vadd.f32 %v1443_v22, %v5126_v50  ;;  %4362 = vmatpush3.bf16.xpose.msk.msra.mxu0 %vm5061_vm2, %v4357_v9  ;;  %v4539_v13 = vpop.eup %4538 }
 0x4a0   :  { %v4363_v10 = vpack.c.bf16 %v4487_v19, %v4486_v20  ;;  %v1465_v11 = vsel %vm238_vm0, %v1449_v21, -inf  ;;  %v1130_v36 = vmul.f32 %v4539_v13, %v5214_v48  ;;  %v1721_v58 = vpop.permute.xlu0 %1720  ;;  %4165 = vmatprep.subr.mxu1 %v600_v35 }
 0x4a1   :  { %1466 = vmax.xlane.f32.xlu1 %v1465_v11  ;;  %v4186_v14 = vpop.f32.mrb[14].mxu0  ;;  %v1462_v25 = vsel %vm238_vm0, %v1444_v28, -inf  ;;  %v1719_v54 = vpop.permute.xlu1 %1718 }
 0x4a2   :  { %4160 = vmatmul.mubr.msk.f32.vlgmr.msra.gmra.mrb[12].mxu1 %vm238_vm0, %v1128_v29  ;;  %4365 = vmatprep.subr.msk.bf16.mxu0 %vm5061_vm2, %v4363_v10  ;;  %v1453_v26 = vpop.f32.mrb[15].mxu0  ;;  %v1459_v40 = vadd.f32 %v4186_v14, %v5134_v62 }
 0x4a3   :  { %4162 = vmatprep.mubr.msk.f32.mxu1 %vm238_vm0, %v1129_v24  ;;  %v1454_v27 = vadd.f32 %v1453_v26, %v5131_v57  ;;  %1463 = vmax.xlane.f32.xlu0 %v1462_v25 }
 0x4a4   :  { %v1471_v41 = vsel %vm238_vm0, %v1459_v40, -inf  ;;  %4166 = vmatpush3.msra.mxu1 %v600_v35 }
 0x4a5   :  { %v1468_v39 = vsel %vm238_vm0, %v1454_v27, -inf  ;;  %v1723_v59 = vpop.permute.xlu1 %1722 }
 0x4a6   :  { %4163 = vmatmul.mubr.msk.f32.gmra.mrb[14].mxu1 %vm238_vm0, %v1130_v36 }
 0x4a7   :  { %4368 = vmatpush3.bf16.xpose.msk.msra.mxu0 %vm5061_vm2, %v4363_v10  ;;  %1469 = vmax.xlane.f32.xlu0 %v1468_v39 }
 0x4ab   :  { %1472 = vmax.xlane.f32.xlu0 %v1471_v41 }
 0x4ae   :  { %4218 = vmatmul.mubr.msk.f32.vlgmr.msra.gmra.mrb[16].mxu0 %vm616_vm1, %v1719_v54 }
 0x4af   :  { %4220 = vmatprep.mubr.msk.f32.mxu0 %vm616_vm1, %v1721_v58 }
 0x4b2   :  { %4221 = vmatmul.mubr.msk.f32.gmra.mrb[18].mxu0 %vm616_vm1, %v1723_v59 }
 0x52e   :  { %v1467_v37 = vpop.xlane.xlu1 %1466 }
 0x52f   :  { %v1475_v38 = vsub.f32 %v1449_v21, %v1467_v37 }
 0x530   :  { %v1464_v49 = vpop.xlane.xlu0 %1463 }
 0x531   :  { %v1480_v46 = vmul.f32 1.442695, %v1475_v38  ;;  %v1474_v48 = vsub.f32 %v1444_v28, %v1464_v49 }
 0x533   :  { %4540 = vpow2.f32 %v1480_v46  ;;  %v1478_v51 = vmul.f32 1.442695, %v1474_v48 }
 0x534   :  { %v1470_v2 = vpop.xlane.xlu0 %1469 }
 0x535   :  { %4542 = vpow2.f32 %v1478_v51  ;;  %v1476_v32 = vsub.f32 %v1454_v27, %v1470_v2 }
 0x537   :  { %v1482_v30 = vmul.f32 1.442695, %v1476_v32 }
 0x538   :  { %v1473_v42 = vpop.xlane.xlu0 %1472 }
 0x539   :  { %4544 = vpow2.f32 %v1482_v30  ;;  %v1477_v53 = vsub.f32 %v1459_v40, %v1473_v42 }
 0x53b   :  { %v1484_v31 = vmul.f32 1.442695, %v1477_v53 }
 0x53d   :  { %v5271_v43 = vpop.eup %4540  ;;  %4546 = vpow2.f32 %v1484_v31 }
 0x53e   :  { %v1489_v33 = vsel %vm238_vm0, %v5271_v43, 0.0 }
 0x53f   :  { %v4543_v34 = vpop.eup %4542  ;;  %1490 = vadd.xlane.f32.xlu0 %v1489_v33 }
 0x540   :  { %v1486_v56 = vsel %vm238_vm0, %v4543_v34, 0.0 }
 0x541   :  { %1487 = vadd.xlane.f32.xlu1 %v1486_v56 }
 0x543   :  { %v4545_v44 = vpop.eup %4544 }
 0x544   :  { %v1492_v60 = vsel %vm238_vm0, %v4545_v44, 0.0 }
 0x545   :  { %1493 = vadd.xlane.f32.xlu1 %v1492_v60 }
 0x547   :  { %v4547_v45 = vpop.eup %4546 }
 0x548   :  { %v1495_v61 = vsel %vm238_vm0, %v4547_v45, 0.0 }
 0x549   :  { %1496 = vadd.xlane.f32.xlu0 %v1495_v61 }
 0x556   :  { %4489 = vrot.lane.b32.xlu1 %v5220_v52, %s4709_s5 }
 0x55f   :  { %4494 = vrot.lane.b32.xlu0 %v5227_v55, %s4709_s5 }
 0x575   :  { %v4161_v63 = vpop.f32.mrb[12].mxu1 }
 0x576   :  { %v1225_v0 = vpop.f32.mrb[13].mxu1 }
 0x577   :  { %4167 = vmatprep.mubr.msk.f32.mxu1 %vm616_vm1, %v1225_v0 }
 0x578   :  { %4168 = vmatmul.mubr.msk.f32.vlgmr.msra.gmra.mrb[8].mxu1 %vm616_vm1, %v4161_v63 }
 0x579   :  { %v4164_v1 = vpop.f32.mrb[14].mxu1 }
 0x57a   :  { %v1235_v3 = vpop.f32.mrb[15].mxu1 }
 0x57b   :  { %4170 = vmatprep.mubr.msk.f32.mxu1 %vm616_vm1, %v1235_v3 }
 0x57c   :  { %4171 = vmatmul.mubr.msk.f32.gmra.mrb[10].mxu1 %vm616_vm1, %v4164_v1 }
 0x581   :  { %v4219_v4 = vpop.f32.mrb[16].mxu0 }
 0x582   :  { %v1820_v5 = vadd.f32 %v4219_v4, %v5124_v47  ;;  %v1814_v6 = vpop.f32.mrb[17].mxu0 }
 0x583   :  { %v1815_v8 = vadd.f32 %v1814_v6, %v5126_v50 }
 0x584   :  { %v1836_v9 = vsel %vm238_vm0, %v1820_v5, -inf }
 0x585   :  { %v4222_v12 = vpop.f32.mrb[18].mxu0  ;;  %1837 = vmax.xlane.f32.xlu0 %v1836_v9  ;;  %v1833_v15 = vsel %vm238_vm0, %v1815_v8, -inf }
 0x586   :  { %v1830_v16 = vadd.f32 %v4222_v12, %v5134_v62  ;;  %v1824_v17 = vpop.f32.mrb[19].mxu0  ;;  %1834 = vmax.xlane.f32.xlu1 %v1833_v15 }
 0x587   :  { %v1825_v18 = vadd.f32 %v1824_v17, %v5131_v57 }
 0x588   :  { %v1842_v19 = vsel %vm238_vm0, %v1830_v16, -inf }
 0x589   :  { %1843 = vmax.xlane.f32.xlu0 %v1842_v19  ;;  %v1839_v47 = vsel %vm238_vm0, %v1825_v18, -inf  ;;  %v602_v19 = vld [vmem:[#allocation5 + $0x18] sm:$0xff] }
 0x58a   :  { %1840 = vmax.xlane.f32.xlu1 %v1839_v47 }
 0x5cc   :  { %v1491_v50 = vpop.xlane.xlu0 %1490 }
 0x5ce   :  { %v1488_v20 = vpop.xlane.xlu1 %1487 }
 0x5cf   :  { %4548 = vrcp.f32 %v1488_v20 }
 0x5d0   :  { %4550 = vrcp.f32 %v1491_v50 }
 0x5d2   :  { %v1494_v21 = vpop.xlane.xlu1 %1493 }
 0x5d3   :  { %4552 = vrcp.f32 %v1494_v21 }
 0x5d6   :  { %v4490_v22 = vpop.permute.xlu1 %4489  ;;  %v1497_v28 = vpop.xlane.xlu0 %1496 }
 0x5d7   :  { %v4492_v29 = vunpack.i.h.bf16 %v4490_v22  ;;  %v4491_v62 = vunpack.i.l.bf16 %v4490_v22  ;;  %4554 = vrcp.f32 %v1497_v28 }
 0x5d9   :  { %v4549_v10 = vpop.eup %4548  ;;  %v4349_v11 = vpack.c.bf16 %v4492_v29, %v4491_v62 }
 0x5da   :  { %v4495_v57 = vpop.permute.xlu0 %4494  ;;  %v1502_v13 = vmul.f32 %v4549_v10, %v4543_v34  ;;  %v4551_v26 = vpop.eup %4550 }
 0x5db   :  { %v4497_v14 = vunpack.i.h.bf16 %v4495_v57  ;;  %v4496_v24 = vunpack.i.l.bf16 %v4495_v57  ;;  %4350 = vmatprep.subr.bf16.mxu1 %v4349_v11  ;;  %v1503_v36 = vmul.f32 %v4551_v26, %v5271_v43 }
 0x5dc   :  { %4352 = vmatpush3.bf16.msra.mxu1 %v4349_v11  ;;  %4195 = vmatprep.mubr.msk.f32.mxu1 %vm238_vm0, %v1502_v13  ;;  %v3890_v11 = vld [vmem:[%s6071_s7] ss:$0 sm:$0xff] }
 0x5dd   :  { %v4353_v25 = vpack.c.bf16 %v4497_v14, %v4496_v24  ;;  %v4553_v27 = vpop.eup %4552 }
 0x5de   :  { %v1504_v40 = vmul.f32 %v4553_v27, %v4545_v44  ;;  %v601_v44 = vld [vmem:[#allocation5 + $0x10] sm:$0xff] }
 0x5df   :  { %4354 = vmatprep.subr.bf16.mxu1 %v4353_v25 }
 0x5e0   :  { %4356 = vmatpush3.bf16.msra.mxu1 %v4353_v25 }
 0x5e1   :  { %v4555_v39 = vpop.eup %4554  ;;  %4201 = vmatprep.subr.mxu1 %v601_v44 }
 0x5e2   :  { %v1505_v41 = vmul.f32 %v4555_v39, %v4547_v45 }
 0x5e3   :  { %4196 = vmatmul.mubr.msk.f32.vlgmr.msra.gmra.mrb[16].mxu1 %vm238_vm0, %v1503_v36 }
 0x5e4   :  { %4198 = vmatprep.mubr.msk.f32.mxu1 %vm238_vm0, %v1504_v40  ;;  %4202 = vmatpush3.msra.mxu1 %v601_v44 }
 0x5e7   :  { %4199 = vmatmul.mubr.msk.f32.gmra.mrb[18].mxu1 %vm238_vm0, %v1505_v41 }
 0x612   :  { %v1838_v54 = vpop.xlane.xlu0 %1837 }
 0x613   :  { %v1846_v58 = vsub.f32 %v1820_v5, %v1838_v54  ;;  %v1835_v59 = vpop.xlane.xlu1 %1834 }
 0x614   :  { %v1845_v35 = vsub.f32 %v1815_v8, %v1835_v59  ;;  %v4588_v59 = vld [vmem:[%s6083_s25 + $0x8] sm:$0x3] }
 0x615   :  { %v1851_v37 = vmul.f32 1.442695, %v1846_v58 }
 0x616   :  { %v1849_v38 = vmul.f32 1.442695, %v1845_v35  ;;  %v1844_v49 = vpop.xlane.xlu0 %1843 }
 0x617   :  { %4556 = vpow2.f32 %v1851_v37  ;;  %v1848_v46 = vsub.f32 %v1830_v16, %v1844_v49  ;;  %v1841_v48 = vpop.xlane.xlu1 %1840 }
 0x618   :  { %4558 = vpow2.f32 %v1849_v38  ;;  %v1847_v51 = vsub.f32 %v1825_v18, %v1841_v48  ;;  %v4589_v48 = vld [vmem:[%s6083_s25 + $0xa] sm:$0x3] }
 0x619   :  { %v1855_v2 = vmul.f32 1.442695, %v1848_v46 }
 0x61a   :  { %v1853_v32 = vmul.f32 1.442695, %v1847_v51 }
 0x61b   :  { %4560 = vpow2.f32 %v1855_v2  ;;  %v4590_v2 = vld [vmem:[%s6083_s25] sm:$0x3] }
 0x61c   :  { %4562 = vpow2.f32 %v1853_v32 }
 0x621   :  { %v4557_v30 = vpop.eup %4556 }
 0x622   :  { %v4559_v42 = vpop.eup %4558  ;;  %v1860_v53 = vsel %vm238_vm0, %v4557_v30, 0.0 }
 0x623   :  { %1861 = vadd.xlane.f32.xlu0 %v1860_v53  ;;  %v1857_v31 = vsel %vm238_vm0, %v4559_v42, 0.0 }
 0x624   :  { %1858 = vadd.xlane.f32.xlu1 %v1857_v31 }
 0x625   :  { %v4561_v43 = vpop.eup %4560 }
 0x626   :  { %v4563_v33 = vpop.eup %4562  ;;  %v1866_v34 = vsel %vm238_vm0, %v4561_v43, 0.0 }
 0x627   :  { %1867 = vadd.xlane.f32.xlu0 %v1866_v34  ;;  %v1863_v56 = vsel %vm238_vm0, %v4563_v33, 0.0 }
 0x628   :  { %1864 = vadd.xlane.f32.xlu1 %v1863_v56 }
 0x639   :  { %4499 = vrot.lane.b32.xlu1 %v5220_v52, %s4711_s18 }
 0x63d   :  { %4504 = vrot.lane.b32.xlu0 %v5227_v55, %s4711_s18 }
 0x6b0   :  { %v1862_v60 = vpop.xlane.xlu0 %1861 }
 0x6b1   :  { %v1859_v45 = vpop.xlane.xlu1 %1858 }
 0x6b2   :  { %4564 = vrcp.f32 %v1859_v45  ;;  %v4593_v45 = vld [vmem:[%s6083_s25 + $0xe] sm:$0x3] }
 0x6b3   :  { %4566 = vrcp.f32 %v1862_v60 }
 0x6b4   :  { %v1868_v61 = vpop.xlane.xlu0 %1867 }
 0x6b5   :  { %v1865_v63 = vpop.xlane.xlu1 %1864 }
 0x6b6   :  { %v4197_v0 = vpop.f32.mrb[16].mxu1  ;;  %4568 = vrcp.f32 %v1865_v63  ;;  %v4594_v63 = vld [vmem:[%s6083_s25 + $0x4] sm:$0x3] }
 0x6b7   :  { %v1596_v1 = vpop.f32.mrb[17].mxu1  ;;  %4570 = vrcp.f32 %v1868_v61 }
 0x6b8   :  { %v4505_v3 = vpop.permute.xlu0 %4504  ;;  %4203 = vmatprep.mubr.msk.f32.mxu1 %vm616_vm1, %v1596_v1 }
 0x6b9   :  { %v4500_v4 = vpop.permute.xlu1 %4499  ;;  %4204 = vmatmul.mubr.msk.f32.vlgmr.msra.gmra.mrb[8].mxu1 %vm616_vm1, %v4197_v0  ;;  %v4507_v5 = vunpack.i.h.bf16 %v4505_v3  ;;  %v4506_v52 = vunpack.i.l.bf16 %v4505_v3 }
 0x6ba   :  { %v4502_v6 = vunpack.i.h.bf16 %v4500_v4  ;;  %v4501_v8 = vunpack.i.l.bf16 %v4500_v4  ;;  %v4200_v55 = vpop.f32.mrb[18].mxu1  ;;  %v4595_v4 = vld [vmem:[%s6083_s25 + $0x6] sm:$0x3] }
 0x6bb   :  { %v1606_v9 = vpop.f32.mrb[19].mxu1  ;;  %v4373_v17 = vpack.c.bf16 %v4507_v5, %v4506_v52 }
 0x6bc   :  { %v4565_v12 = vpop.eup %4564  ;;  %v4369_v15 = vpack.c.bf16 %v4502_v6, %v4501_v8  ;;  %4206 = vmatprep.mubr.msk.f32.mxu1 %vm616_vm1, %v1606_v9  ;;  %v4596_v6 = vld [vmem:[%s6083_s25 + $0x18] sm:$0x3] }
 0x6bd   :  { %4207 = vmatmul.mubr.msk.f32.gmra.mrb[10].mxu1 %vm616_vm1, %v4200_v55  ;;  %v1873_v16 = vmul.f32 %v4565_v12, %v4559_v42  ;;  %v4567_v18 = vpop.eup %4566  ;;  %v4591_v42 = vld [vmem:[%s6083_s25 + $0xc] sm:$0x3]  ;;  %v4597_v12 = vld [vmem:[%s6083_s25 + $0x1a] sm:$0x3] }
 0x6be   :  { %4370 = vmatprep.subr.bf16.mxu1 %v4369_v15  ;;  %v1874_v20 = vmul.f32 %v4567_v18, %v4557_v30  ;;  %v4599_v18 = vld [vmem:[%s6083_s25 + $0x10] sm:$0x3] }
 0x6bf   :  { %4372 = vmatpush3.bf16.msra.mxu1 %v4369_v15  ;;  %4231 = vmatprep.mubr.msk.f32.mxu1 %vm238_vm0, %v1873_v16  ;;  %v4598_v16 = vld [vmem:[%s6083_s25 + $0x1c] sm:$0x3] }
 0x6c0   :  { %4374 = vmatprep.subr.bf16.mxu1 %v4373_v17  ;;  %v4569_v47 = vpop.eup %4568 }
 0x6c1   :  { %v4571_v50 = vpop.eup %4570  ;;  %v1875_v21 = vmul.f32 %v4569_v47, %v4563_v33 }
 0x6c2   :  { %v1876_v22 = vmul.f32 %v4571_v50, %v4561_v43  ;;  %v4592_v43 = vld [vmem:[%s6083_s25 + $0x2] sm:$0x3]  ;;  %v4600_v50 = vld [vmem:[%s6083_s25 + $0x12] sm:$0x3] }
 0x6c3   :  { %4376 = vmatpush3.bf16.msra.mxu1 %v4373_v17 }
 0x6c4   :  { %4237 = vmatprep.subr.mxu1 %v602_v19 }
 0x6c6   :  { %4232 = vmatmul.mubr.msk.f32.vlgmr.msra.gmra.mrb[20].mxu1 %vm238_vm0, %v1874_v20 }
 0x6c7   :  { %4234 = vmatprep.mubr.msk.f32.mxu1 %vm238_vm0, %v1875_v21  ;;  %4238 = vmatpush3.msra.mxu1 %v602_v19 }
 0x6ca   :  { %4235 = vmatmul.mubr.msk.f32.gmra.mrb[22].mxu1 %vm238_vm0, %v1876_v22 }
 0x799   :  { %v4233_v28 = vpop.f32.mrb[20].mxu1 }
 0x79a   :  { %v1967_v29 = vpop.f32.mrb[21].mxu1 }
 0x79b   :  { %4239 = vmatprep.mubr.msk.f32.mxu1 %vm616_vm1, %v1967_v29 }
 0x79c   :  { %4240 = vmatmul.mubr.msk.f32.vlgmr.msra.gmra.mrb[8].mxu1 %vm616_vm1, %v4233_v28 }
 0x79d   :  { %v4236_v62 = vpop.f32.mrb[22].mxu1 }
 0x79e   :  { %v1977_v10 = vpop.f32.mrb[23].mxu1 }
 0x79f   :  { %4242 = vmatprep.mubr.msk.f32.mxu1 %vm616_vm1, %v1977_v10  ;;  %v4601_v10 = vld [vmem:[%s6083_s25 + $0x1e] sm:$0x3] }
 0x7a0   :  { %4243 = vmatmul.mubr.msk.f32.gmra.mrb[10].mxu1 %vm616_vm1, %v4236_v62 }
 0x86f   :  { %v4241_v57 = vpop.f32.mrb[8].mxu1 }
 0x870   :  { %v4401_v13 = vadd.f32 %v4241_v57, %v3890_v11  ;;  %v2064_v14 = vpop.f32.mrb[9].mxu1 }
 0x871   :  { %v4402_v24 = vadd.f32 %v3890_v11, %v2064_v14 }
 0x872   :  { %v2108_v25 = vcombine.high %v4401_v13, %v4401_v13  ;;  %v2115_v26 = vrot.slane %v4401_v13, %v4908_v23  ;;  %v4602_v13 = vld [vmem:[%s6083_s25 + $0x14] sm:$0x3] }
 0x873   :  { %v2091_v27 = vcombine.high %v4402_v24, %v4402_v24  ;;  %v2098_v36 = vrot.slane %v4402_v24, %v4908_v23  ;;  %v4244_v39 = vpop.f32.mrb[10].mxu1  ;;  %v4603_v24 = vld [vmem:[%s6083_s25 + $0x16] sm:$0x3] }
 0x874   :  { %v2122_v40 = vrot.slane %v2108_v25, %v4908_v23  ;;  %v2123_v41 = vcombine.high %v2115_v26, %v2115_v26  ;;  %v4403_v54 = vadd.f32 %v4244_v39, %v3890_v11  ;;  %v2074_v58 = vpop.f32.mrb[11].mxu1  ;;  %v5328_v35 = vadd.f32 %v4588_v59, %v2115_v26 }
 0x875   :  { %v2105_v37 = vrot.slane %v2091_v27, %v4908_v23  ;;  %v2106_v38 = vcombine.high %v2098_v36, %v2098_v36  ;;  %v4404_v49 = vadd.f32 %v3890_v11, %v2074_v58  ;;  %v5339_v32 = vadd.f32 %v4590_v2, %v2098_v36 }
 0x876   :  { %v2124_v46 = vcombine.high %v2122_v40, %v2122_v40  ;;  %v5334_v51 = vadd.f32 %v4589_v48, %v2123_v41  ;;  %v2142_v30 = vcombine.high %v4403_v54, %v4403_v54  ;;  %v5344_v53 = vadd.f32 %v4591_v42, %v2122_v40 }
 0x877   :  { %v2107_v31 = vcombine.high %v2105_v37, %v2105_v37  ;;  %v5349_v33 = vadd.f32 %v4592_v43, %v2106_v38  ;;  %v2149_v34 = vrot.slane %v4403_v54, %v4908_v23  ;;  %v2125_v44 = vcombine.high %v4404_v49, %v4404_v49 }
 0x878   :  { %v2156_v56 = vrot.slane %v2142_v30, %v4908_v23  ;;  %v2132_v60 = vrot.slane %v4404_v49, %v4908_v23  ;;  %v5357_v61 = vadd.f32 %v4593_v45, %v2124_v46  ;;  %v5362_v0 = vadd.f32 %v4594_v63, %v2105_v37 }
 0x879   :  { %v2157_v1 = vcombine.high %v2149_v34, %v2149_v34  ;;  %v2226_v3 = vcombine.low %v5328_v35, %v5334_v51  ;;  %v5369_v5 = vadd.f32 %v4595_v4, %v2107_v31  ;;  %v5374_v8 = vadd.f32 %v4596_v6, %v2149_v34 }
 0x87a   :  { %v2158_v52 = vcombine.high %v2156_v56, %v2156_v56  ;;  %v2139_v55 = vrot.slane %v2125_v44, %v4908_v23  ;;  %v2140_v9 = vcombine.high %v2132_v60, %v2132_v60  ;;  %v5385_v17 = vadd.f32 %v4598_v16, %v2156_v56 }
 0x87b   :  { %v5380_v15 = vadd.f32 %v4597_v12, %v2157_v1  ;;  %v5390_v19 = vadd.f32 %v4599_v18, %v2132_v60  ;;  %v2227_v47 = vcombine.low %v5344_v53, %v5357_v61  ;;  %v2234_v22 = vrot.slane %v2226_v3, %v4908_v23 }
 0x87c   :  { %v2141_v20 = vcombine.high %v2139_v55, %v2139_v55  ;;  %v5397_v21 = vadd.f32 %v4600_v50, %v2140_v9  ;;  %v2209_v28 = vcombine.low %v5339_v32, %v5349_v33  ;;  %v2210_v62 = vcombine.low %v5362_v0, %v5369_v5 }
 0x87d   :  { %v2241_v29 = vrot.slane %v2227_v47, %v4908_v23  ;;  %v5408_v11 = vadd.f32 %v4601_v10, %v2158_v52  ;;  %v2260_v57 = vcombine.low %v5374_v8, %v5380_v15  ;;  %v5415_v14 = vadd.f32 %v4602_v13, %v2139_v55 }
 0x87e   :  { %v5420_v25 = vadd.f32 %v4603_v24, %v2141_v20  ;;  %v2243_v26 = vcombine.low %v5390_v19, %v5397_v21  ;;  %v2217_v36 = vrot.slane %v2209_v28, %v4908_v23  ;;  %v2224_v39 = vrot.slane %v2210_v62, %v4908_v23 }
 0x87f   :  { %v2242_v27 = vcombine.low %v2234_v22, %v2241_v29  ;;  %v2261_v40 = vcombine.low %v5385_v17, %v5408_v11  ;;  %v2268_v59 = vrot.slane %v2260_v57, %v4908_v23  ;;  %v4712_v31 = vmov 269488144  }
 0x880   :  { %v2244_v41 = vcombine.low %v5415_v14, %v5420_v25  ;;  %v2225_v58 = vcombine.low %v2217_v36, %v2224_v39  ;;  %v2251_v38 = vrot.slane %v2243_v26, %v4908_v23  ;;  %v2303_v43 = vunpack.c.l.s4 %v4712_v31 }
 0x881   :  { %v2284_v54 = vsel %vm238_vm0, %v2242_v27, 0.0  ;;  %v2275_v37 = vrot.slane %v2261_v40, %v4908_v23  ;;  %v4713_v34 = vmov 842150450   ;;  %v4714_v44 = vmov 1414812756  }
 0x882   :  { %2285 = vadd.xlane.f32.xlu0 %v2284_v54  ;;  %v2258_v49 = vrot.slane %v2244_v41, %v4908_v23  ;;  %v2281_v46 = vsel %vm238_vm0, %v2225_v58, 0.0  ;;  %v2310_v56 = vunpack.c.l.s4 %v4713_v34  ;;  %v2317_v60 = vunpack.c.l.s4 %v4714_v44 }
 0x883   :  { %v2276_v48 = vcombine.low %v2268_v59, %v2275_v37  ;;  %2282 = vadd.xlane.f32.xlu1 %v2281_v46  ;;  %v4715_v45 = vmov 1987475062   ;;  %v2304_v1 = vunpack.c.0.s8 %v2303_v43 }
 0x884   :  { %v2259_v2 = vcombine.low %v2251_v38, %v2258_v49  ;;  %v2324_v63 = vunpack.c.l.s4 %v4715_v45  ;;  %v2311_v3 = vunpack.c.0.s8 %v2310_v56  ;;  %v2318_v4 = vunpack.c.0.s8 %v2317_v60 }
 0x885   :  { %v2290_v30 = vsel %vm238_vm0, %v2276_v48, 0.0  ;;  %v5439_v6 = vsub.s32 %v2304_v1, %v4866_v7 }
 0x886   :  { %2291 = vadd.xlane.f32.xlu0 %v2290_v30  ;;  %v2287_v42 = vsel %vm238_vm0, %v2259_v2, 0.0  ;;  %v2325_v52 = vunpack.c.0.s8 %v2324_v63  ;;  %v5442_v55 = vsub.s32 %v2311_v3, %v4866_v7  ;;  %v5445_v9 = vsub.s32 %v2318_v4, %v4866_v7 }
 0x887   :  { %2288 = vadd.xlane.f32.xlu1 %v2287_v42 }
 0x888   :  { %v5448_v12 = vsub.s32 %v2325_v52, %v4866_v7 }
 0x90f   :  { %v2286_v16 = vpop.xlane.xlu0 %2285 }
 0x910   :  { %v2295_v18 = vmul.f32 0.03125, %v2286_v16  ;;  %v2283_v47 = vpop.xlane.xlu1 %2282 }
 0x911   :  { %v2294_v29 = vmul.f32 0.03125, %v2283_v47 }
 0x912   :  { %v2336_v20 = vrot.slane %v2295_v18, %v5439_v6  ;;  %v2343_v50 = vrot.slane %v2295_v18, %v5442_v55  ;;  %v2350_v22 = vrot.slane %v2295_v18, %v5445_v9  ;;  %v2357_v28 = vrot.slane %v2295_v18, %v5448_v12 }
 0x913   :  { %v2292_v62 = vpop.xlane.xlu0 %2291  ;;  %v2308_v24 = vrot.slane %v2294_v29, %v5439_v6  ;;  %v2315_v26 = vrot.slane %v2294_v29, %v5442_v55  ;;  %v2322_v27 = vrot.slane %v2294_v29, %v5445_v9  ;;  %v2329_v36 = vrot.slane %v2294_v29, %v5448_v12 }
 0x914   :  { %v2297_v10 = vmul.f32 0.03125, %v2292_v62  ;;  %v5455_v57 = vsub.f32 %v5328_v35, %v2336_v20  ;;  %v5458_v7 = vsub.f32 %v5334_v51, %v2343_v50  ;;  %v5461_v13 = vsub.f32 %v5344_v53, %v2350_v22  ;;  %v2289_v39 = vpop.xlane.xlu1 %2288 }
 0x915   :  { %v2296_v54 = vmul.f32 0.03125, %v2289_v39  ;;  %v5472_v53 = vsub.f32 %v5357_v61, %v2357_v28  ;;  %v5481_v38 = vsub.f32 %v5339_v32, %v2308_v24  ;;  %v5484_v49 = vsub.f32 %v5349_v33, %v2315_v26 }
 0x916   :  { %v2392_v40 = vrot.slane %v2297_v10, %v5439_v6  ;;  %v2399_v35 = vrot.slane %v2297_v10, %v5442_v55  ;;  %v2406_v41 = vrot.slane %v2297_v10, %v5445_v9  ;;  %v2413_v51 = vrot.slane %v2297_v10, %v5448_v12 }
 0x917   :  { %v2450_v58 = vmul.f32 %v5455_v57, %v5455_v57  ;;  %v2451_v59 = vmul.f32 %v5458_v7, %v5458_v7  ;;  %v2452_v37 = vmul.f32 %v5461_v13, %v5461_v13  ;;  %v5487_v46 = vsub.f32 %v5362_v0, %v2322_v27 }
 0x918   :  { %v2364_v61 = vrot.slane %v2296_v54, %v5439_v6  ;;  %v2371_v48 = vrot.slane %v2296_v54, %v5442_v55  ;;  %v2378_v2 = vrot.slane %v2296_v54, %v5445_v9  ;;  %v2385_v30 = vrot.slane %v2296_v54, %v5448_v12 }
 0x919   :  { %v2453_v42 = vmul.f32 %v5472_v53, %v5472_v53  ;;  %v2495_v31 = vcombine.low %v2450_v58, %v2451_v59  ;;  %v5496_v32 = vsub.f32 %v5369_v5, %v2329_v36  ;;  %v2446_v33 = vmul.f32 %v5481_v38, %v5481_v38  ;;  %v2806_v59 = vld [vmem:[#allocation7] sm:$0xff] }
 0x91a   :  { %v2447_v0 = vmul.f32 %v5484_v49, %v5484_v49  ;;  %v2448_v43 = vmul.f32 %v5487_v46, %v5487_v46  ;;  %v5505_v34 = vsub.f32 %v5374_v8, %v2392_v40  ;;  %v5508_v56 = vsub.f32 %v5380_v15, %v2399_v35 }
 0x91b   :  { %v2496_v44 = vcombine.low %v2452_v37, %v2453_v42  ;;  %v2503_v60 = vrot.slane %v2495_v31, %v4908_v23  ;;  %v2449_v5 = vmul.f32 %v5496_v32, %v5496_v32  ;;  %v5514_v45 = vsub.f32 %v5385_v17, %v2406_v41  ;;  %v2807_v37 = vld [vmem:[#allocation7 + $0x8] sm:$0xff]  ;;  %v2998_v42 = vld [vmem:[%s6074_s10] sm:$0xff] }
 0x91c   :  { %v2478_v63 = vcombine.low %v2446_v33, %v2447_v0  ;;  %v5517_v1 = vsub.f32 %v5408_v11, %v2413_v51  ;;  %v2458_v8 = vmul.f32 %v5505_v34, %v5505_v34  ;;  %v2459_v15 = vmul.f32 %v5508_v56, %v5508_v56  ;;  %v2999_v31 = vld [vmem:[%s6074_s10 + $0x8] sm:$0xff]  ;;  %v3000_v33 = vld [vmem:[%s6074_s10 + $0x10] sm:$0xff] }
 0x91d   :  { %v2510_v3 = vrot.slane %v2496_v44, %v4908_v23  ;;  %v2479_v4 = vcombine.low %v2448_v43, %v2449_v5  ;;  %v2460_v52 = vmul.f32 %v5514_v45, %v5514_v45  ;;  %v5527_v16 = vsub.f32 %v5390_v19, %v2364_v61  ;;  %v2808_v61 = vld [vmem:[#allocation7 + $0x10] sm:$0xff]  ;;  %v3001_v43 = vld [vmem:[%s6074_s10 + $0x18] sm:$0xff]  ;;  %v3003_v5 = vld [vmem:[%s6074_s10 + $0x28] sm:$0xff] }
 0x91e   :  { %v2486_v17 = vrot.slane %v2478_v63, %v4908_v23  ;;  %v2461_v11 = vmul.f32 %v5517_v1, %v5517_v1  ;;  %v2529_v18 = vcombine.low %v2458_v8, %v2459_v15  ;;  %v5533_v47 = vsub.f32 %v5397_v21, %v2371_v48 }
 0x91f   :  { %v2511_v20 = vcombine.low %v2503_v60, %v2510_v3  ;;  %v2493_v50 = vrot.slane %v2479_v4, %v4908_v23  ;;  %v5537_v22 = vsub.f32 %v5415_v14, %v2378_v2  ;;  %v5540_v28 = vsub.f32 %v5420_v25, %v2385_v30  ;;  %v2809_v2 = vld [vmem:[#allocation7 + $0x18] sm:$0xff]  ;;  %v3002_v60 = vld [vmem:[%s6074_s10 + $0x20] sm:$0xff] }
 0x920   :  { %v2530_v19 = vcombine.low %v2460_v52, %v2461_v11  ;;  %v2537_v29 = vrot.slane %v2529_v18, %v4908_v23  ;;  %v2454_v62 = vmul.f32 %v5527_v16, %v5527_v16  ;;  %v2455_v10 = vmul.f32 %v5533_v47, %v5533_v47  ;;  %v3939_v18 = vld [vmem:[%s6076_s12] ss:$0 sm:$0xff] }
 0x921   :  { %v2553_v21 = vsel %vm238_vm0, %v2511_v20, 0.0  ;;  %v2494_v24 = vcombine.low %v2486_v17, %v2493_v50  ;;  %v2456_v26 = vmul.f32 %v5537_v22, %v5537_v22  ;;  %v2457_v14 = vmul.f32 %v5540_v28, %v5540_v28  ;;  %v3940_v20 = vld [vmem:[%s6077_s13] ss:$0 sm:$0xff] }
 0x922   :  { %2554 = vadd.xlane.f32.xlu0 %v2553_v21  ;;  %v2544_v25 = vrot.slane %v2530_v19, %v4908_v23  ;;  %v2512_v27 = vcombine.low %v2454_v62, %v2455_v10  ;;  %v4377_v48 = vpack.c.bf16 %v2807_v37, %v2806_v59  ;;  %v4381_v30 = vpack.c.bf16 %v2809_v2, %v2808_v61 }
 0x923   :  { %v2550_v36 = vsel %vm238_vm0, %v2494_v24, 0.0  ;;  %v2513_v39 = vcombine.low %v2456_v26, %v2457_v14  ;;  %v4385_v0 = vpack.c.bf16 %v2999_v31, %v2998_v42  ;;  %v4389_v44 = vpack.c.bf16 %v3001_v43, %v3000_v33 }
 0x924   :  { %2551 = vadd.xlane.f32.xlu1 %v2550_v36  ;;  %v2545_v40 = vcombine.low %v2537_v29, %v2544_v25  ;;  %v2520_v35 = vrot.slane %v2512_v27, %v4908_v23  ;;  %4378 = vmatprep.subr.bf16.mxu0 %v4377_v48  ;;  %v4393_v63 = vpack.c.bf16 %v3003_v5, %v3002_v60 }
 0x925   :  { %v2527_v41 = vrot.slane %v2513_v39, %v4908_v23  ;;  %4380 = vmatpush3.bf16.msra.mxu0 %v4377_v48  ;;  %4386 = vmatprep.subr.bf16.mxu1 %v4385_v0  ;;  %v2727_v62 = vcombine.high %v3939_v18, %v3939_v18  ;;  %v2769_v10 = vcombine.high %v3940_v20, %v3940_v20 }
 0x926   :  { %v2559_v51 = vsel %vm238_vm0, %v2545_v40, 0.0  ;;  %4382 = vmatprep.subr.bf16.mxu0 %v4381_v30  ;;  %4388 = vmatpush3.bf16.msra.mxu1 %v4385_v0  ;;  %v5583_v26 = vrot.slane %v3939_v18, %v4908_v23  ;;  %v5589_v25 = vrot.slane %v3940_v20, %v4908_v23 }
 0x927   :  { %2560 = vadd.xlane.f32.xlu0 %v2559_v51  ;;  %v2528_v54 = vcombine.low %v2520_v35, %v2527_v41  ;;  %4390 = vmatprep.subr.bf16.mxu1 %v4389_v44  ;;  %v5586_v14 = vrot.slane %v2727_v62, %v4908_v23  ;;  %v5592_v27 = vrot.slane %v2769_v10, %v4908_v23 }
 0x928   :  { %v5608_v59 = vcombine.high %v5589_v25, %v5589_v25 }
 0x929   :  { %v2556_v58 = vsel %vm238_vm0, %v2528_v54, 0.0  ;;  %4384 = vmatpush3.bf16.msra.mxu0 %v4381_v30  ;;  %v5600_v54 = vcombine.high %v5583_v26, %v5583_v26  ;;  %v5612_v37 = vcombine.high %v5592_v27, %v5592_v27 }
 0x92a   :  { %2557 = vadd.xlane.f32.xlu1 %v2556_v58  ;;  %4392 = vmatpush3.bf16.msra.mxu1 %v4389_v44  ;;  %v5604_v58 = vcombine.high %v5586_v14, %v5586_v14 }
 0x92b   :  { %4394 = vmatprep.subr.bf16.mxu1 %v4393_v63 }
 0x92e   :  { %4396 = vmatpush3.bf16.msra.mxu1 %v4393_v63 }
 0x9af   :  { %v2555_v8 = vpop.xlane.xlu0 %2554 }
 0x9b0   :  { %v2563_v15 = vmul.f32 0.03125, %v2555_v8 }
 0x9b1   :  { %v2552_v3 = vpop.xlane.xlu1 %2551 }
 0x9b2   :  { %v2567_v4 = vadd.f32 1e-05, %v2563_v15  ;;  %v2562_v52 = vmul.f32 0.03125, %v2552_v3 }
 0x9b4   :  { %4572 = vrsqrt.f32 %v2567_v4  ;;  %v2566_v17 = vadd.f32 1e-05, %v2562_v52  ;;  %v2561_v11 = vpop.xlane.xlu0 %2560 }
 0x9b5   :  { %v2565_v50 = vmul.f32 0.03125, %v2561_v11 }
 0x9b6   :  { %4574 = vrsqrt.f32 %v2566_v17 }
 0x9b7   :  { %v2558_v19 = vpop.xlane.xlu1 %2557  ;;  %v2569_v21 = vadd.f32 1e-05, %v2565_v50 }
 0x9b8   :  { %v2564_v29 = vmul.f32 0.03125, %v2558_v19 }
 0x9ba   :  { %v2568_v24 = vadd.f32 1e-05, %v2564_v29 }
 0x9bc   :  { %4576 = vrsqrt.f32 %v2568_v24 }
 0x9bd   :  { %4578 = vrsqrt.f32 %v2569_v21 }
 0x9be   :  { %v4573_v36 = vpop.eup %4572 }
 0x9bf   :  { %v2612_v39 = vrot.slane %v4573_v36, %v5439_v6  ;;  %v2619_v40 = vrot.slane %v4573_v36, %v5442_v55  ;;  %v2626_v35 = vrot.slane %v4573_v36, %v5445_v9  ;;  %v2633_v41 = vrot.slane %v4573_v36, %v5448_v12 }
 0x9c0   :  { %v4575_v51 = vpop.eup %4574 }
 0x9c1   :  { %v2584_v61 = vrot.slane %v4575_v51, %v5439_v6  ;;  %v2591_v48 = vrot.slane %v4575_v51, %v5442_v55  ;;  %v2598_v2 = vrot.slane %v4575_v51, %v5445_v9  ;;  %v2605_v30 = vrot.slane %v4575_v51, %v5448_v12 }
 0x9c2   :  { %v2710_v42 = vmul.f32 %v2612_v39, %v5455_v57  ;;  %v2711_v31 = vmul.f32 %v2619_v40, %v5458_v7  ;;  %v2712_v33 = vmul.f32 %v2626_v35, %v5461_v13  ;;  %v2713_v0 = vmul.f32 %v2633_v41, %v5472_v53 }
 0x9c3   :  { %v2706_v43 = vmul.f32 %v2584_v61, %v5481_v38  ;;  %v2707_v44 = vmul.f32 %v2591_v48, %v5484_v49  ;;  %v2708_v60 = vmul.f32 %v2598_v2, %v5487_v46  ;;  %v2709_v5 = vmul.f32 %v2605_v30, %v5496_v32 }
 0x9c4   :  { %v2752_v63 = vmul.f32 %v5583_v26, %v2710_v42  ;;  %v2753_v8 = vmul.f32 %v5600_v54, %v2711_v31  ;;  %v2754_v57 = vmul.f32 %v5586_v14, %v2712_v33  ;;  %v2755_v7 = vmul.f32 %v5604_v58, %v2713_v0 }
 0x9c5   :  { %v2748_v13 = vmul.f32 %v5583_v26, %v2706_v43  ;;  %v2749_v53 = vmul.f32 %v5600_v54, %v2707_v44  ;;  %v2750_v38 = vmul.f32 %v5586_v14, %v2708_v60  ;;  %v2751_v49 = vmul.f32 %v5604_v58, %v2709_v5 }
 0x9c6   :  { %v4577_v15 = vpop.eup %4576  ;;  %v5635_v46 = vadd.f32 %v5589_v25, %v2752_v63  ;;  %v5638_v32 = vadd.f32 %v5608_v59, %v2753_v8  ;;  %v5641_v3 = vadd.f32 %v5592_v27, %v2754_v57  ;;  %v5644_v4 = vadd.f32 %v5612_v37, %v2755_v7 }
 0x9c7   :  { %v5647_v52 = vadd.f32 %v5589_v25, %v2748_v13  ;;  %v5650_v17 = vadd.f32 %v5608_v59, %v2749_v53  ;;  %v5653_v11 = vadd.f32 %v5592_v27, %v2750_v38  ;;  %v5656_v18 = vadd.f32 %v5612_v37, %v2751_v49  ;;  %v4579_v20 = vpop.eup %4578 }
 0x9c8   :  { %v2850_v50 = vcombine.low %v5635_v46, %v5638_v32  ;;  %v2851_v19 = vcombine.low %v5641_v3, %v5644_v4  ;;  %v2640_v29 = vrot.slane %v4577_v15, %v5439_v6  ;;  %v2647_v62 = vrot.slane %v4577_v15, %v5442_v55 }
 0x9c9   :  { %v2833_v10 = vcombine.low %v5647_v52, %v5650_v17  ;;  %v2834_v21 = vcombine.low %v5653_v11, %v5656_v18  ;;  %v2654_v24 = vrot.slane %v4577_v15, %v5445_v9  ;;  %v2661_v36 = vrot.slane %v4577_v15, %v5448_v12 }
 0x9ca   :  { %v2858_v39 = vrot.slane %v2850_v50, %v4908_v23  ;;  %v2865_v40 = vrot.slane %v2851_v19, %v4908_v23  ;;  %v2714_v35 = vmul.f32 %v2640_v29, %v5527_v16  ;;  %v2715_v41 = vmul.f32 %v2647_v62, %v5533_v47 }
 0x9cb   :  { %v2841_v51 = vrot.slane %v2833_v10, %v4908_v23  ;;  %v2848_v61 = vrot.slane %v2834_v21, %v4908_v23  ;;  %v2716_v48 = vmul.f32 %v2654_v24, %v5537_v22  ;;  %v2717_v2 = vmul.f32 %v2661_v36, %v5540_v28  ;;  %v3941_v10 = vld [vmem:[%s6073_s9] ss:$0 sm:$0xff] }
 0x9cc   :  { %v2866_v30 = vcombine.low %v2858_v39, %v2865_v40  ;;  %v2756_v42 = vmul.f32 %v5583_v26, %v2714_v35  ;;  %v2757_v31 = vmul.f32 %v5600_v54, %v2715_v41  ;;  %v2668_v33 = vrot.slane %v4579_v20, %v5439_v6 }
 0x9cd   :  { %v2849_v0 = vcombine.low %v2841_v51, %v2848_v61  ;;  %v2758_v16 = vmul.f32 %v5586_v14, %v2716_v48  ;;  %v2759_v47 = vmul.f32 %v5604_v58, %v2717_v2  ;;  %v2675_v43 = vrot.slane %v4579_v20, %v5442_v55 }
 0x9ce   :  { %v5685_v44 = vadd.f32 %v5589_v25, %v2756_v42  ;;  %v5688_v22 = vadd.f32 %v5608_v59, %v2757_v31  ;;  %v2682_v28 = vrot.slane %v4579_v20, %v5445_v9  ;;  %v2689_v60 = vrot.slane %v4579_v20, %v5448_v12  ;;  %v3946_v42 = vld [vmem:[%s6075_s11] ss:$0 sm:$0xff] }
 0x9cf   :  { %4253 = vmatprep.mubr.msk.f32.mxu0 %vm238_vm0, %v2849_v0  ;;  %v5694_v5 = vadd.f32 %v5592_v27, %v2758_v16  ;;  %v5697_v63 = vadd.f32 %v5612_v37, %v2759_v47  ;;  %v2718_v8 = vmul.f32 %v2668_v33, %v5505_v34  ;;  %v2719_v57 = vmul.f32 %v2675_v43, %v5508_v56 }
 0x9d0   :  { %4254 = vmatmul.mubr.msk.f32.vlgmr.msra.gmra.mrb[20].mxu0 %vm238_vm0, %v2866_v30  ;;  %v2867_v7 = vcombine.low %v5685_v44, %v5688_v22  ;;  %v2720_v13 = vmul.f32 %v2682_v28, %v5514_v45  ;;  %v2721_v53 = vmul.f32 %v2689_v60, %v5517_v1 }
 0x9d1   :  { %v2868_v38 = vcombine.low %v5694_v5, %v5697_v63  ;;  %v2760_v49 = vmul.f32 %v5583_v26, %v2718_v8  ;;  %v2761_v15 = vmul.f32 %v5600_v54, %v2719_v57 }
 0x9d2   :  { %v2875_v34 = vrot.slane %v2867_v7, %v4908_v23  ;;  %v2762_v56 = vmul.f32 %v5586_v14, %v2720_v13  ;;  %v2763_v20 = vmul.f32 %v5604_v58, %v2721_v53 }
 0x9d3   :  { %v2882_v50 = vrot.slane %v2868_v38, %v4908_v23  ;;  %v5715_v19 = vadd.f32 %v5589_v25, %v2760_v49  ;;  %v5718_v45 = vadd.f32 %v5608_v59, %v2761_v15 }
 0x9d4   :  { %v5721_v1 = vadd.f32 %v5592_v27, %v2762_v56  ;;  %v5724_v26 = vadd.f32 %v5612_v37, %v2763_v20  ;;  %v3004_v27 = vld [vmem:[%s6074_s10 + $0x30] sm:$0xff]  ;;  %v3005_v37 = vld [vmem:[%s6074_s10 + $0x38] sm:$0xff] }
 0x9d5   :  { %v2883_v54 = vcombine.low %v2875_v34, %v2882_v50  ;;  %v2884_v14 = vcombine.low %v5715_v19, %v5718_v45  ;;  %v4397_v62 = vpack.c.bf16 %v3005_v37, %v3004_v27 }
 0x9d6   :  { %v2885_v58 = vcombine.low %v5721_v1, %v5724_v26 }
 0x9d7   :  { %4256 = vmatprep.mubr.msk.f32.mxu0 %vm238_vm0, %v2883_v54  ;;  %v2892_v25 = vrot.slane %v2884_v14, %v4908_v23  ;;  %4398 = vmatprep.subr.bf16.mxu1 %v4397_v62 }
 0x9d8   :  { %v2899_v59 = vrot.slane %v2885_v58, %v4908_v23  ;;  %4400 = vmatpush3.bf16.msra.mxu1 %v4397_v62 }
 0x9da   :  { %v2900_v29 = vcombine.low %v2892_v25, %v2899_v59 }
 0x9dc   :  { %4257 = vmatmul.mubr.msk.f32.gmra.mrb[22].mxu0 %vm238_vm0, %v2900_v29 }
 0xaa3   :  { %v4255_v21 = vpop.f32.mrb[20].mxu0 }
 0xaa4   :  { %v2981_v24 = vadd.f32 %v4255_v21, %v3941_v10  ;;  %v2975_v36 = vpop.f32.mrb[21].mxu0 }
 0xaa5   :  { %v2976_v39 = vadd.f32 %v3941_v10, %v2975_v36 }
 0xaa6   :  { %v2995_v35 = vmax.f32 %v2981_v24, 0.0 }
 0xaa7   :  { %v2994_v40 = vmax.f32 %v2976_v39, 0.0 }
 0xaa9   :  { %4275 = vmatprep.mubr.msk.f32.mxu1 %vm3013_vm7, %v2994_v40 }
 0xaaa   :  { %4276 = vmatmul.mubr.msk.f32.vlgmr.msra.gmra.mrb[24].mxu1 %vm3013_vm7, %v2995_v35 }
 0xaaf   :  { %v4258_v41 = vpop.f32.mrb[22].mxu0 }
 0xab0   :  { %v2991_v51 = vadd.f32 %v4258_v41, %v3941_v10  ;;  %v2985_v61 = vpop.f32.mrb[23].mxu0 }
 0xab1   :  { %v2986_v48 = vadd.f32 %v3941_v10, %v2985_v61 }
 0xab2   :  { %v2997_v30 = vmax.f32 %v2991_v51, 0.0 }
 0xab3   :  { %v2996_v2 = vmax.f32 %v2986_v48, 0.0 }
 0xab5   :  { %4278 = vmatprep.mubr.msk.f32.mxu1 %vm3013_vm7, %v2996_v2 }
 0xab6   :  { %4279 = vmatmul.mubr.msk.f32.gmra.mrb[26].mxu1 %vm3013_vm7, %v2997_v30 }
 0xb7d   :  { %v4277_v31 = vpop.f32.mrb[24].mxu1 }
 0xb7e   :  { %v3098_v33 = vadd.f32 %v4277_v31, %v3946_v42  ;;  %v3092_v0 = vpop.f32.mrb[25].mxu1 }
 0xb7f   :  { %v3093_v16 = vadd.f32 %v3946_v42, %v3092_v0 }
 0xb80   :  { %v3132_v47 = vcombine.high %v3098_v33, %v3098_v33  ;;  %v3139_v43 = vrot.slane %v3098_v33, %v4908_v23 }
 0xb81   :  { %v3115_v28 = vcombine.high %v3093_v16, %v3093_v16  ;;  %v3122_v60 = vrot.slane %v3093_v16, %v4908_v23 }
 0xb82   :  { %v3146_v8 = vrot.slane %v3132_v47, %v4908_v23  ;;  %v3147_v57 = vcombine.high %v3139_v43, %v3139_v43  ;;  %v5751_v38 = vadd.f32 %v3139_v43, %v5635_v46 }
 0xb83   :  { %v3129_v7 = vrot.slane %v3115_v28, %v4908_v23  ;;  %v3130_v13 = vcombine.high %v3122_v60, %v3122_v60  ;;  %v5757_v34 = vadd.f32 %v3122_v60, %v5647_v52 }
 0xb84   :  { %v3148_v53 = vcombine.high %v3146_v8, %v3146_v8  ;;  %v5754_v49 = vadd.f32 %v3147_v57, %v5638_v32  ;;  %v5763_v20 = vadd.f32 %v3146_v8, %v5641_v3 }
 0xb85   :  { %v3131_v15 = vcombine.high %v3129_v7, %v3129_v7  ;;  %v5760_v56 = vadd.f32 %v3130_v13, %v5650_v17  ;;  %v5771_v54 = vadd.f32 %v3129_v7, %v5653_v11 }
 0xb86   :  { %v5766_v50 = vadd.f32 %v3148_v53, %v5644_v4  ;;  %v3250_v46 = vcombine.low %v5751_v38, %v5754_v49 }
 0xb87   :  { %v5774_v32 = vadd.f32 %v3131_v15, %v5656_v18  ;;  %v3233_v52 = vcombine.low %v5757_v34, %v5760_v56 }
 0xb88   :  { %v3251_v17 = vcombine.low %v5763_v20, %v5766_v50  ;;  %v3258_v25 = vrot.slane %v3250_v46, %v4908_v23 }
 0xb89   :  { %v4280_v3 = vpop.f32.mrb[26].mxu1  ;;  %v3234_v4 = vcombine.low %v5771_v54, %v5774_v32  ;;  %v3241_v18 = vrot.slane %v3233_v52, %v4908_v23 }
 0xb8a   :  { %v3108_v14 = vadd.f32 %v4280_v3, %v3946_v42  ;;  %v3102_v58 = vpop.f32.mrb[27].mxu1  ;;  %v3265_v11 = vrot.slane %v3251_v17, %v4908_v23 }
 0xb8b   :  { %v3103_v59 = vadd.f32 %v3946_v42, %v3102_v58  ;;  %v3248_v29 = vrot.slane %v3234_v4, %v4908_v23 }
 0xb8c   :  { %v3166_v27 = vcombine.high %v3108_v14, %v3108_v14  ;;  %v3173_v37 = vrot.slane %v3108_v14, %v4908_v23  ;;  %v3266_v62 = vcombine.low %v3258_v25, %v3265_v11 }
 0xb8d   :  { %v3149_v10 = vcombine.high %v3103_v59, %v3103_v59  ;;  %v3156_v21 = vrot.slane %v3103_v59, %v4908_v23  ;;  %v3249_v24 = vcombine.low %v3241_v18, %v3248_v29 }
 0xb8e   :  { %v3180_v36 = vrot.slane %v3166_v27, %v4908_v23  ;;  %v3181_v39 = vcombine.high %v3173_v37, %v3173_v37  ;;  %v3308_v40 = vsel %vm238_vm0, %v3266_v62, 0.0  ;;  %v5793_v48 = vadd.f32 %v3173_v37, %v5715_v19 }
 0xb8f   :  { %v3163_v35 = vrot.slane %v3149_v10, %v4908_v23  ;;  %v3164_v41 = vcombine.high %v3156_v21, %v3156_v21  ;;  %3309 = vadd.xlane.f32.xlu0 %v3308_v40  ;;  %v3305_v51 = vsel %vm238_vm0, %v3249_v24, 0.0  ;;  %v5799_v42 = vadd.f32 %v3156_v21, %v5685_v44 }
 0xb90   :  { %v3182_v61 = vcombine.high %v3180_v36, %v3180_v36  ;;  %v5796_v2 = vadd.f32 %v3181_v39, %v5718_v45  ;;  %3306 = vadd.xlane.f32.xlu1 %v3305_v51  ;;  %v5805_v33 = vadd.f32 %v3180_v36, %v5721_v1 }
 0xb91   :  { %v3165_v30 = vcombine.high %v3163_v35, %v3163_v35  ;;  %v5802_v31 = vadd.f32 %v3164_v41, %v5688_v22  ;;  %v5813_v45 = vadd.f32 %v3163_v35, %v5694_v5 }
 0xb92   :  { %v5808_v0 = vadd.f32 %v3182_v61, %v5724_v26  ;;  %v3284_v19 = vcombine.low %v5793_v48, %v5796_v2 }
 0xb93   :  { %v5816_v16 = vadd.f32 %v3165_v30, %v5697_v63  ;;  %v3267_v44 = vcombine.low %v5799_v42, %v5802_v31 }
 0xb94   :  { %v3285_v22 = vcombine.low %v5805_v33, %v5808_v0  ;;  %v3292_v26 = vrot.slane %v3284_v19, %v4908_v23 }
 0xb95   :  { %v3268_v1 = vcombine.low %v5813_v45, %v5816_v16  ;;  %v3275_v43 = vrot.slane %v3267_v44, %v4908_v23 }
 0xb96   :  { %v3299_v47 = vrot.slane %v3285_v22, %v4908_v23 }
 0xb97   :  { %v3282_v5 = vrot.slane %v3268_v1, %v4908_v23 }
 0xb98   :  { %v3300_v28 = vcombine.low %v3292_v26, %v3299_v47 }
 0xb99   :  { %v3283_v63 = vcombine.low %v3275_v43, %v3282_v5 }
 0xb9a   :  { %v3314_v60 = vsel %vm238_vm0, %v3300_v28, 0.0 }
 0xb9b   :  { %3315 = vadd.xlane.f32.xlu0 %v3314_v60  ;;  %v3311_v8 = vsel %vm238_vm0, %v3283_v63, 0.0 }
 0xb9c   :  { %3312 = vadd.xlane.f32.xlu1 %v3311_v8 }
 0xc1c   :  { %v3310_v57 = vpop.xlane.xlu0 %3309 }
 0xc1d   :  { %v3318_v7 = vmul.f32 0.03125, %v3310_v57  ;;  %v3307_v13 = vpop.xlane.xlu1 %3306 }
 0xc1e   :  { %v3317_v53 = vmul.f32 0.03125, %v3307_v13 }
 0xc1f   :  { %v3359_v15 = vrot.slane %v3318_v7, %v5439_v6  ;;  %v3366_v46 = vrot.slane %v3318_v7, %v5442_v55  ;;  %v3373_v52 = vrot.slane %v3318_v7, %v5445_v9  ;;  %v3380_v17 = vrot.slane %v3318_v7, %v5448_v12 }
 0xc20   :  { %v3331_v3 = vrot.slane %v3317_v53, %v5439_v6  ;;  %v3338_v4 = vrot.slane %v3317_v53, %v5442_v55  ;;  %v3345_v14 = vrot.slane %v3317_v53, %v5445_v9  ;;  %v3352_v58 = vrot.slane %v3317_v53, %v5448_v12 }
 0xc21   :  { %v5839_v25 = vsub.f32 %v5751_v38, %v3359_v15  ;;  %v5842_v11 = vsub.f32 %v5754_v49, %v3366_v46  ;;  %v5845_v59 = vsub.f32 %v5763_v20, %v3373_v52  ;;  %v5848_v18 = vsub.f32 %v5766_v50, %v3380_v17 }
 0xc22   :  { %v5851_v29 = vsub.f32 %v5757_v34, %v3331_v3  ;;  %v5854_v27 = vsub.f32 %v5760_v56, %v3338_v4  ;;  %v5857_v37 = vsub.f32 %v5771_v54, %v3345_v14  ;;  %v5860_v38 = vsub.f32 %v5774_v32, %v3352_v58 }
 0xc23   :  { %v3473_v49 = vmul.f32 %v5839_v25, %v5839_v25  ;;  %v3474_v20 = vmul.f32 %v5842_v11, %v5842_v11  ;;  %v3475_v50 = vmul.f32 %v5845_v59, %v5845_v59  ;;  %v3476_v34 = vmul.f32 %v5848_v18, %v5848_v18 }
 0xc24   :  { %v3469_v56 = vmul.f32 %v5851_v29, %v5851_v29  ;;  %v3470_v54 = vmul.f32 %v5854_v27, %v5854_v27  ;;  %v3471_v32 = vmul.f32 %v5857_v37, %v5857_v37  ;;  %v3472_v62 = vmul.f32 %v5860_v38, %v5860_v38 }
 0xc25   :  { %v3518_v10 = vcombine.low %v3473_v49, %v3474_v20  ;;  %v3519_v21 = vcombine.low %v3475_v50, %v3476_v34 }
 0xc26   :  { %v3501_v24 = vcombine.low %v3469_v56, %v3470_v54  ;;  %v3502_v36 = vcombine.low %v3471_v32, %v3472_v62 }
 0xc27   :  { %v3526_v39 = vrot.slane %v3518_v10, %v4908_v23  ;;  %v3533_v40 = vrot.slane %v3519_v21, %v4908_v23 }
 0xc28   :  { %v3316_v35 = vpop.xlane.xlu0 %3315  ;;  %v3509_v41 = vrot.slane %v3501_v24, %v4908_v23  ;;  %v3516_v51 = vrot.slane %v3502_v36, %v4908_v23 }
 0xc29   :  { %v3320_v61 = vmul.f32 0.03125, %v3316_v35  ;;  %v3313_v30 = vpop.xlane.xlu1 %3312  ;;  %v3534_v19 = vcombine.low %v3526_v39, %v3533_v40 }
 0xc2a   :  { %v3319_v44 = vmul.f32 0.03125, %v3313_v30  ;;  %v3517_v22 = vcombine.low %v3509_v41, %v3516_v51  ;;  %v3951_v41 = vld [vmem:[%s6078_s14] ss:$0 sm:$0xff]  ;;  %s4716_s14 = smov [#allocation8]  }
 0xc2b   :  { %v3415_v1 = vrot.slane %v3320_v61, %v5439_v6  ;;  %v3422_v26 = vrot.slane %v3320_v61, %v5442_v55  ;;  %v3429_v47 = vrot.slane %v3320_v61, %v5445_v9  ;;  %v3436_v43 = vrot.slane %v3320_v61, %v5448_v12  ;;  %v3952_v51 = vld [vmem:[%s6079_s15] ss:$0 sm:$0xff]  ;;  %s3851_s15 = sshll.u32 %s4716_s14, 4  ;;  %s3852_s15 = int_to_ptr.vmem [resolvable:$true] %s3851_s15 }
 0xc2c   :  { %v3387_v5 = vrot.slane %v3319_v44, %v5439_v6  ;;  %v3394_v28 = vrot.slane %v3319_v44, %v5442_v55  ;;  %v3401_v63 = vrot.slane %v3319_v44, %v5445_v9  ;;  %v3408_v60 = vrot.slane %v3319_v44, %v5448_v12  ;;  %s4670_s25 = scalar_lea.vmem %s3852_s15, 512  ;;  %p4675_p11 = scmp.lt.s32.totalorder %s3852_s15, %s3852_s15 }
 0xc2d   :  { %v3576_v8 = vsel %vm238_vm0, %v3534_v19, 0.0  ;;  %v3573_v57 = vsel %vm238_vm0, %v3517_v22, 0.0  ;;  %v5893_v7 = vsub.f32 %v5793_v48, %v3415_v1  ;;  %v5896_v13 = vsub.f32 %v5796_v2, %v3422_v26  ;;  %p4671_p10 = scmp.ne.s32.totalorder %s3852_s15, %s4670_s25  ;;  %p4676_p12 = scmp.lt.s32.totalorder %s4670_s25, %s4670_s25 }
 0xc2e   :  { %3577 = vadd.xlane.f32.xlu0 %v3576_v8  ;;  %3574 = vadd.xlane.f32.xlu1 %v3573_v57  ;;  %v5899_v53 = vsub.f32 %v5805_v33, %v3429_v47  ;;  %v5902_v15 = vsub.f32 %v5808_v0, %v3436_v43  ;;  %v5905_v46 = vsub.f32 %v5799_v42, %v3387_v5 }
 0xc2f   :  { %v3481_v52 = vmul.f32 %v5893_v7, %v5893_v7  ;;  %v3482_v48 = vmul.f32 %v5896_v13, %v5896_v13  ;;  %v5912_v2 = vsub.f32 %v5802_v31, %v3394_v28  ;;  %v5915_v17 = vsub.f32 %v5813_v45, %v3401_v63  ;;  %p4677_p13 = por %p4676_p12, %p4675_p11 }
 0xc30   :  { %v3483_v33 = vmul.f32 %v5899_v53, %v5899_v53  ;;  %v3484_v0 = vmul.f32 %v5902_v15, %v5902_v15  ;;  %v5922_v42 = vsub.f32 %v5816_v16, %v3408_v60  ;;  %v3477_v3 = vmul.f32 %v5905_v46, %v5905_v46 }
 0xc31   :  { %v3552_v4 = vcombine.low %v3481_v52, %v3482_v48  ;;  %v3478_v31 = vmul.f32 %v5912_v2, %v5912_v2  ;;  %v3479_v45 = vmul.f32 %v5915_v17, %v5915_v17  ;;  %v3750_v61 = vcombine.high %v3951_v41, %v3951_v41  ;;  %p4678_p0 = pnand %p4677_p13, %p4671_p10 }
 0xc32   :  { %v3553_v14 = vcombine.low %v3483_v33, %v3484_v0  ;;  %v3480_v58 = vmul.f32 %v5922_v42, %v5922_v42  ;;  %v3792_v30 = vcombine.high %v3952_v51, %v3952_v51  ;;  %v5945_v19 = vrot.slane %v3951_v41, %v4908_v23 }
 0xc33   :  { %v3560_v49 = vrot.slane %v3552_v4, %v4908_v23  ;;  %v3535_v20 = vcombine.low %v3477_v3, %v3478_v31  ;;  %v5948_v44 = vrot.slane %v3952_v51, %v4908_v23  ;;  %v5951_v22 = vrot.slane %v3750_v61, %v4908_v23 }
 0xc34   :  { %v3567_v16 = vrot.slane %v3553_v14, %v4908_v23  ;;  %v3536_v50 = vcombine.low %v3479_v45, %v3480_v58  ;;  %v5954_v1 = vrot.slane %v3792_v30, %v4908_v23  ;;  %v5958_v5 = vcombine.high %v5945_v19, %v5945_v19 }
 0xc35   :  { %v3543_v34 = vrot.slane %v3535_v20, %v4908_v23  ;;  %v5962_v28 = vcombine.high %v5948_v44, %v5948_v44  ;;  %v5966_v60 = vcombine.high %v5951_v22, %v5951_v22 }
 0xc36   :  { %v3568_v56 = vcombine.low %v3560_v49, %v3567_v16  ;;  %v3550_v54 = vrot.slane %v3536_v50, %v4908_v23  ;;  %v5970_v23 = vcombine.high %v5954_v1, %v5954_v1 }
 0xc38   :  { %v3582_v32 = vsel %vm238_vm0, %v3568_v56, 0.0  ;;  %v3551_v62 = vcombine.low %v3543_v34, %v3550_v54 }
 0xc39   :  { %3583 = vadd.xlane.f32.xlu0 %v3582_v32 }
 0xc3a   :  { %v3579_v10 = vsel %vm238_vm0, %v3551_v62, 0.0 }
 0xc3b   :  { %3580 = vadd.xlane.f32.xlu1 %v3579_v10 }
 0xcbb   :  { %v3578_v21 = vpop.xlane.xlu0 %3577  ;;  %v3575_v24 = vpop.xlane.xlu1 %3574 }
 0xcbc   :  { %v3586_v36 = vmul.f32 0.03125, %v3578_v21  ;;  %v3585_v39 = vmul.f32 0.03125, %v3575_v24 }
 0xcbe   :  { %v3590_v40 = vadd.f32 1e-05, %v3586_v36  ;;  %v3589_v35 = vadd.f32 1e-05, %v3585_v39 }
 0xcc0   :  { %4580 = vrsqrt.f32 %v3590_v40 }
 0xcc1   :  { %4582 = vrsqrt.f32 %v3589_v35 }
 0xcc6   :  { %v3584_v26 = vpop.xlane.xlu0 %3583 }
 0xcc7   :  { %v3588_v47 = vmul.f32 0.03125, %v3584_v26 }
 0xcc8   :  { %v3581_v43 = vpop.xlane.xlu1 %3580 }
 0xcc9   :  { %v3592_v8 = vadd.f32 1e-05, %v3588_v47  ;;  %v3587_v57 = vmul.f32 0.03125, %v3581_v43 }
 0xcca   :  { %v4581_v63 = vpop.eup %4580 }
 0xccb   :  { %v4583_v52 = vpop.eup %4582  ;;  %v3635_v48 = vrot.slane %v4581_v63, %v5439_v6  ;;  %v3642_v33 = vrot.slane %v4581_v63, %v5442_v55  ;;  %v3649_v0 = vrot.slane %v4581_v63, %v5445_v9  ;;  %v3656_v3 = vrot.slane %v4581_v63, %v5448_v12 }
 0xccc   :  { %v3607_v4 = vrot.slane %v4583_v52, %v5439_v6  ;;  %v3614_v31 = vrot.slane %v4583_v52, %v5442_v55  ;;  %v3621_v45 = vrot.slane %v4583_v52, %v5445_v9  ;;  %v3628_v14 = vrot.slane %v4583_v52, %v5448_v12 }
 0xccd   :  { %v3733_v58 = vmul.f32 %v3635_v48, %v5839_v25  ;;  %v3734_v49 = vmul.f32 %v3642_v33, %v5842_v11  ;;  %v3735_v20 = vmul.f32 %v3649_v0, %v5845_v59  ;;  %v3736_v16 = vmul.f32 %v3656_v3, %v5848_v18 }
 0xcce   :  { %v3729_v50 = vmul.f32 %v3607_v4, %v5851_v29  ;;  %v3730_v34 = vmul.f32 %v3614_v31, %v5854_v27  ;;  %v3731_v56 = vmul.f32 %v3621_v45, %v5857_v37  ;;  %v3732_v54 = vmul.f32 %v3628_v14, %v5860_v38 }
 0xccf   :  { %v3775_v32 = vmul.f32 %v5945_v19, %v3733_v58  ;;  %v3776_v62 = vmul.f32 %v5958_v5, %v3734_v49  ;;  %v3777_v25 = vmul.f32 %v5951_v22, %v3735_v20  ;;  %v3778_v11 = vmul.f32 %v5966_v60, %v3736_v16 }
 0xcd0   :  { %v3771_v59 = vmul.f32 %v5945_v19, %v3729_v50  ;;  %v3772_v18 = vmul.f32 %v5958_v5, %v3730_v34  ;;  %v3773_v29 = vmul.f32 %v5951_v22, %v3731_v56  ;;  %v3774_v27 = vmul.f32 %v5966_v60, %v3732_v54 }
 0xcd1   :  { %v3817_v37 = vadd.f32 %v5948_v44, %v3775_v32  ;;  %v3818_v38 = vadd.f32 %v5962_v28, %v3776_v62  ;;  %v3819_v10 = vadd.f32 %v5954_v1, %v3777_v25  ;;  %v3820_v21 = vadd.f32 %v5970_v23, %v3778_v11 }
 0xcd2   :  { %v3813_v24 = vadd.f32 %v5948_v44, %v3771_v59  ;;  %v3814_v36 = vadd.f32 %v5962_v28, %v3772_v18  ;;  %v3815_v39 = vadd.f32 %v5954_v1, %v3773_v29  ;;  %v3816_v40 = vadd.f32 %v5970_v23, %v3774_v27 }
 0xcd3   :  { %3834 = vst.msk [vmem:[#allocation8 + $0x8] sm:$0x3] %vm3829_vm8, %v3817_v37  ;;  %3835 = vst.msk [vmem:[#allocation8 + $0xa] sm:$0x3] %vm3829_vm8, %v3818_v38  ;;  %4584 = vrsqrt.f32 %v3592_v8  ;;  %v3591_v35 = vadd.f32 1e-05, %v3587_v57 }
 0xcd4   :  { %3836 = vst.msk [vmem:[#allocation8 + $0xc] sm:$0x3] %vm3829_vm8, %v3819_v10  ;;  %3837 = vst.msk [vmem:[#allocation8 + $0xe] sm:$0x3] %vm3829_vm8, %v3820_v21 }
 0xcd5   :  { %3830 = vst.msk [vmem:[#allocation8] sm:$0x3] %vm3829_vm8, %v3813_v24  ;;  %3831 = vst.msk [vmem:[#allocation8 + $0x2] sm:$0x3] %vm3829_vm8, %v3814_v36  ;;  %4586 = vrsqrt.f32 %v3591_v35 }
 0xcd6   :  { %3832 = vst.msk [vmem:[#allocation8 + $0x4] sm:$0x3] %vm3829_vm8, %v3815_v39  ;;  %3833 = vst.msk [vmem:[#allocation8 + $0x6] sm:$0x3] %vm3829_vm8, %v3816_v40 }
 0xcdd   :  { %v4585_v41 = vpop.eup %4584 }
 0xcde   :  { %v3691_v51 = vrot.slane %v4585_v41, %v5439_v6  ;;  %v3698_v61 = vrot.slane %v4585_v41, %v5442_v55  ;;  %v3705_v30 = vrot.slane %v4585_v41, %v5445_v9  ;;  %v3712_v26 = vrot.slane %v4585_v41, %v5448_v12 }
 0xcdf   :  { %v4587_v47 = vpop.eup %4586 }
 0xce0   :  { %v3741_v43 = vmul.f32 %v3691_v51, %v5893_v7  ;;  %v3742_v63 = vmul.f32 %v3698_v61, %v5896_v13  ;;  %v3743_v8 = vmul.f32 %v3705_v30, %v5899_v53  ;;  %v3744_v57 = vmul.f32 %v3712_v26, %v5902_v15 }
 0xce1   :  { %v3663_v52 = vrot.slane %v4587_v47, %v5439_v6  ;;  %v3670_v48 = vrot.slane %v4587_v47, %v5442_v55  ;;  %v3677_v33 = vrot.slane %v4587_v47, %v5445_v9  ;;  %v3684_v0 = vrot.slane %v4587_v47, %v5448_v12 }
 0xce2   :  { %v3783_v3 = vmul.f32 %v5945_v19, %v3741_v43  ;;  %v3784_v4 = vmul.f32 %v5958_v5, %v3742_v63  ;;  %v3785_v7 = vmul.f32 %v5951_v22, %v3743_v8  ;;  %v3786_v13 = vmul.f32 %v5966_v60, %v3744_v57 }
 0xce3   :  { %v3737_v53 = vmul.f32 %v3663_v52, %v5905_v46  ;;  %v3738_v15 = vmul.f32 %v3670_v48, %v5912_v2  ;;  %v3739_v6 = vmul.f32 %v3677_v33, %v5915_v17  ;;  %v3740_v55 = vmul.f32 %v3684_v0, %v5922_v42 }
 0xce4   :  { %v3825_v9 = vadd.f32 %v5948_v44, %v3783_v3  ;;  %v3826_v12 = vadd.f32 %v5962_v28, %v3784_v4  ;;  %v3827_v31 = vadd.f32 %v5954_v1, %v3785_v7  ;;  %v3828_v45 = vadd.f32 %v5970_v23, %v3786_v13 }
 0xce5   :  { %v3779_v14 = vmul.f32 %v5945_v19, %v3737_v53  ;;  %v3780_v46 = vmul.f32 %v5958_v5, %v3738_v15  ;;  %v3781_v2 = vmul.f32 %v5951_v22, %v3739_v6  ;;  %v3782_v17 = vmul.f32 %v5966_v60, %v3740_v55 }
 0xce6   :  { %3842 = vst.msk [vmem:[#allocation8 + $0x18] sm:$0x3] %vm3829_vm8, %v3825_v9  ;;  %3843 = vst.msk [vmem:[#allocation8 + $0x1a] sm:$0x3] %vm3829_vm8, %v3826_v12 }
 0xce7   :  { %3844 = vst.msk [vmem:[#allocation8 + $0x1c] sm:$0x3] %vm3829_vm8, %v3827_v31  ;;  %3845 = vst.msk [vmem:[#allocation8 + $0x1e] sm:$0x3] %vm3829_vm8, %v3828_v45  ;;  %v3821_v42 = vadd.f32 %v5948_v44, %v3779_v14  ;;  %v3822_v58 = vadd.f32 %v5962_v28, %v3780_v46  ;;  %v3823_v19 = vadd.f32 %v5954_v1, %v3781_v2 }
 0xce8   :  { %v3824_v5 = vadd.f32 %v5970_v23, %v3782_v17 }
 0xce9   :  { %3838 = vst.msk [vmem:[#allocation8 + $0x10] sm:$0x3] %vm3829_vm8, %v3821_v42  ;;  %3839 = vst.msk [vmem:[#allocation8 + $0x12] sm:$0x3] %vm3829_vm8, %v3822_v58 }
 0xcea   :  { %3840 = vst.msk [vmem:[#allocation8 + $0x14] sm:$0x3] %vm3829_vm8, %v3823_v19  ;;  %3841 = vst.msk [vmem:[#allocation8 + $0x16] sm:$0x3] %vm3829_vm8, %v3824_v5 }
 0xceb   :  { %4681 = shalt.err (!%p4678_p0)
}
 0xcec   :  { %s4682_s22 = scalar_lea.hbm %s6080_s16, 512 }
 0xced   :  { %p4683_p1 = scmp.ne.s32.totalorder %s6080_s16, %s4682_s22  ;;  %p4686_p2 = scmp.lt.u32.totalorder %s4682_s22, %s6080_s16 }
 0xcef   :  { %p4688_p3 = pnand %p4686_p2, %p4683_p1 }
 0xcf1   :  { %4691 = shalt.err (!%p4688_p3)
}
 0xcf2   :  { %s4717_s5 = smov 32   ;;  %s4718_s8 = smov 2  }
 0xcf3   :  { %3857 = dma.vmem_to_hbm [thread:$0]  %s3852_s15, 512, %s6080_s16, [#allocation4], %s4717_s5, %s4717_s5, %s4718_s8  }
 0xcf4   :  { %4696 = dma.done.wait [#allocation4], 512  }
 0xcf5   :  { %4697 = vsyncadd [#allocation4], 4294966784 }
 0xcf6   :  { %3861 = vsyncpa [#allocation3], 1 }
 0xcf7   :  { %3862 = vsyncpa [#allocation6], 1 }
 0xcf8   :  { %3863 = vsyncpa [#allocation4], 1 }

</bundles_post_ra>
